<compile_context>
chip_gen: v6e
topology: v6e:2x2x1
jax: 0.10.0
libtpu: 0.0.40
codegen_flags: <defaults>
</compile_context>

<pallas_src>
import jax
import jax.numpy as jnp
from jax import lax
from jax.experimental import pallas as pl
from jax.experimental.pallas import tpu as pltpu


def _make_lstm_kernel(num_layers, S, B, H):
    """Builds a kernel for a fixed (num_layers, S, B, H) configuration."""

    def kernel(*refs):
        # refs = x, (w_ih_l, w_hh_l, b_l) * L, wf, bf, out, seq_scratch, gx_scratch
        x_ref = refs[0]
        layer_refs = refs[1:1 + 3 * num_layers]
        wf_ref = refs[1 + 3 * num_layers]
        bf_ref = refs[2 + 3 * num_layers]
        o_ref = refs[3 + 3 * num_layers]
        seq_ref = refs[4 + 3 * num_layers]   # (S*B, H)   inter-layer hidden sequence
        gx_ref = refs[5 + 3 * num_layers]    # (S*B, 4H)  fused input-gate preactivations

        h_last = jnp.zeros((B, H), jnp.float32)

        for l in range(num_layers):          # static unroll over layers
            w_ih = layer_refs[3 * l][...]    # (D_l, 4H)
            w_hh = layer_refs[3 * l + 1][...]  # (H, 4H)
            b = layer_refs[3 * l + 2][...]   # (1, 4H)  (= b_ih + b_hh)

            # Layer input: raw x for layer 0, previous layer's hidden seq after.
            inp = x_ref[...] if l == 0 else seq_ref[...]          # (S*B, D_l)

            # One tall MXU matmul: all timesteps x all four gates at once.
            gx_ref[...] = (
                jnp.dot(inp, w_ih, preferred_element_type=jnp.float32) + b
            )                                                      # (S*B, 4H)

            def step(t, carry, w_hh=w_hh):
                h, c = carry
                row = pl.multiple_of(t * B, B)
                g = gx_ref[pl.ds(row, B), :] + jnp.dot(
                    h, w_hh, preferred_element_type=jnp.float32)   # (B, 4H)
                i_g = jax.nn.sigmoid(g[:, 0:H])
                f_g = jax.nn.sigmoid(g[:, H:2 * H])
                c_g = jnp.tanh(g[:, 2 * H:3 * H])
                o_g = jax.nn.sigmoid(g[:, 3 * H:4 * H])
                c_new = f_g * c + i_g * c_g
                h_new = o_g * jnp.tanh(c_new)
                seq_ref[pl.ds(row, B), :] = h_new                  # feed next layer
                return h_new, c_new

            h0 = jnp.zeros((B, H), jnp.float32)
            c0 = jnp.zeros((B, H), jnp.float32)
            h_last, _ = lax.fori_loop(0, S, step, (h0, c0), unroll=True)

        # fc on the last timestep of the top layer, then sigmoid (self.act).
        logits = jnp.dot(h_last, wf_ref[...],
                         preferred_element_type=jnp.float32) + bf_ref[...]
        o_ref[...] = jax.nn.sigmoid(logits).astype(o_ref.dtype)

    return kernel


def lstm_model(x, layer_params, wf, bf):
    """x: (B, S, D_in) f32.
    layer_params: list of (w_ih (D_l, 4H), w_hh (H, 4H), b (1, 4H)), gate order [i,f,g,o].
    wf: (H, 1), bf: (1, 1). Returns sigmoid(fc(h_T)) of shape (B, 1)."""
    B, S, D_in = x.shape
    H = layer_params[0][1].shape[0]
    num_layers = len(layer_params)

    # Time-major, flattened: row t*B + b holds (batch b, time t). Host-side, free.
    x_tm = jnp.transpose(x, (1, 0, 2)).reshape(S * B, D_in)

    flat_w = []
    for (w_ih, w_hh, b) in layer_params:
        flat_w += [w_ih, w_hh, b]

    kernel = _make_lstm_kernel(num_layers, S, B, H)

    return pl.pallas_call(
        kernel,
        out_shape=jax.ShapeDtypeStruct((B, 1), jnp.float32),
        scratch_shapes=[
            pltpu.VMEM((S * B, H), jnp.float32),       # inter-layer hidden sequence
            pltpu.VMEM((S * B, 4 * H), jnp.float32),   # fused gate pre-activations
        ],
    )(x_tm, *flat_w, wf, bf)


def reference_lstm(x, layer_params, wf, bf):
    """Plain-JAX reference mirroring torch.nn.LSTM(batch_first=True) + fc + sigmoid."""
    B, S, _ = x.shape
    H = layer_params[0][1].shape[0]
    hp = jax.lax.Precision.HIGHEST
    inp = x
    for (w_ih, w_hh, b) in layer_params:
        h = jnp.zeros((B, H), jnp.float32)
        c = jnp.zeros((B, H), jnp.float32)
        outs = []
        for t in range(S):
            g = (jnp.dot(inp[:, t, :], w_ih, precision=hp)
                 + jnp.dot(h, w_hh, precision=hp) + b)
            i_g = jax.nn.sigmoid(g[:, 0:H])
            f_g = jax.nn.sigmoid(g[:, H:2 * H])
            c_g = jnp.tanh(g[:, 2 * H:3 * H])
            o_g = jax.nn.sigmoid(g[:, 3 * H:4 * H])
            c = f_g * c + i_g * c_g
            h = o_g * jnp.tanh(c)
            outs.append(h)
        inp = jnp.stack(outs, axis=1)                  # (B, S, H)
    return jax.nn.sigmoid(jnp.dot(inp[:, -1, :], wf, precision=hp) + bf)


if __name__ == "__main__":
    # Shapes implied by the module's forward: (batch, seq, input_size), 2 stacked layers.
    B, S, D_in, H, L = 2, 8, 16, 32, 2

    key = jax.random.PRNGKey(0)
    keys = iter(jax.random.split(key, 4 * L + 3))

    x = jax.random.normal(next(keys), (B, S, D_in), dtype=jnp.float32)

    layer_params = []
    for l in range(L):
        d_l = D_in if l == 0 else H
        w_ih = jax.random.normal(next(keys), (d_l, 4 * H), dtype=jnp.float32) * 0.1
        w_hh = jax.random.normal(next(keys), (H, 4 * H), dtype=jnp.float32) * 0.1
        b_ih = jax.random.normal(next(keys), (1, 4 * H), dtype=jnp.float32) * 0.1
        b_hh = jax.random.normal(next(keys), (1, 4 * H), dtype=jnp.float32) * 0.1
        layer_params.append((w_ih, w_hh, b_ih + b_hh))   # PyTorch adds both biases

    wf = jax.random.normal(next(keys), (H, 1), dtype=jnp.float32) * 0.1
    bf = jax.random.normal(next(keys), (1, 1), dtype=jnp.float32) * 0.1

    out = lstm_model(x, layer_params, wf, bf)
    out = jax.block_until_ready(out)

    ref = reference_lstm(x, layer_params, wf, bf)
    assert out.shape == (B, 1), out.shape
    assert jnp.allclose(out, ref, atol=2e-3, rtol=2e-3), (out, ref)

    print("KERNEL_OK")
</pallas_src>

<mosaic_0001>
module attributes {stable_mosaic.version = 11 : i64} {
  func.func @kernel(%arg0: memref<16x16xf32, #tpu.memory_space<vmem>>, %arg1: memref<16x128xf32, #tpu.memory_space<vmem>>, %arg2: memref<32x128xf32, #tpu.memory_space<vmem>>, %arg3: memref<1x128xf32, #tpu.memory_space<vmem>>, %arg4: memref<32x128xf32, #tpu.memory_space<vmem>>, %arg5: memref<32x128xf32, #tpu.memory_space<vmem>>, %arg6: memref<1x128xf32, #tpu.memory_space<vmem>>, %arg7: memref<32x1xf32, #tpu.memory_space<vmem>>, %arg8: memref<1x1xf32, #tpu.memory_space<vmem>>, %arg9: memref<2x1xf32, #tpu.memory_space<vmem>>, %arg10: memref<16x32xf32, #tpu.memory_space<vmem>>, %arg11: memref<16x128xf32, #tpu.memory_space<vmem>>) attributes {dimension_semantics = [], scalar_prefetch = 0 : i64, scratch_operands = 2 : i64, tpu.core_type = #tpu.core_type<tc>} {
    %c0 = arith.constant 0 : index
    %c0_0 = arith.constant 0 : index
    %0 = vector.load %arg1[%c0, %c0_0] : memref<16x128xf32, #tpu.memory_space<vmem>>, vector<16x128xf32>
    %c0_1 = arith.constant 0 : index
    %c0_2 = arith.constant 0 : index
    %1 = vector.load %arg2[%c0_1, %c0_2] : memref<32x128xf32, #tpu.memory_space<vmem>>, vector<32x128xf32>
    %c0_3 = arith.constant 0 : index
    %c0_4 = arith.constant 0 : index
    %2 = vector.load %arg3[%c0_3, %c0_4] : memref<1x128xf32, #tpu.memory_space<vmem>>, vector<1x128xf32>
    %c0_5 = arith.constant 0 : index
    %c0_6 = arith.constant 0 : index
    %3 = vector.load %arg0[%c0_5, %c0_6] : memref<16x16xf32, #tpu.memory_space<vmem>>, vector<16x16xf32>
    %cst = arith.constant dense<0.000000e+00> : vector<16x128xf32>
    %4 = tpu.matmul %3, %0, %cst {dimension_numbers = #tpu.dot_dimension_numbers<[1], [0], [0], [1], [0, 0, 1, 1], [], []>} : vector<16x16xf32>, vector<16x128xf32>, vector<16x128xf32> -> vector<16x128xf32>
    %5 = vector.broadcast %2 : vector<1x128xf32> to vector<16x128xf32>
    %6 = arith.addf %4, %5 : vector<16x128xf32>
    %c0_7 = arith.constant 0 : index
    %c0_8 = arith.constant 0 : index
    %7 = vector.load %arg11[%c0_7, %c0_8] : memref<16x128xf32, #tpu.memory_space<vmem>>, vector<16x128xf32>
    tpu.vector_store %arg11[%c0_7, %c0_8], %6 {strides = array<i32>} : memref<16x128xf32, #tpu.memory_space<vmem>>, vector<16x128xf32>,
    %cst_9 = arith.constant 0.000000e+00 : f32
    %8 = vector.broadcast %cst_9 : f32 to vector<2x32xf32>
    %cst_10 = arith.constant 0.000000e+00 : f32
    %9 = vector.broadcast %cst_10 : f32 to vector<2x32xf32>
    %c0_i32 = arith.constant 0 : i32
    %c2_i32 = arith.constant 2 : i32
    %10 = arith.muli %c0_i32, %c2_i32 : i32
    %11 = tpu.assume_multiple %10, 2 : i32
    %12 = arith.index_cast %11 : i32 to index
    %c0_11 = arith.constant 0 : index
    %13 = vector.load %arg11[%12, %c0_11] : memref<16x128xf32, #tpu.memory_space<vmem>>, vector<2x128xf32>
    %cst_12 = arith.constant dense<0.000000e+00> : vector<2x128xf32>
    %14 = tpu.matmul %8, %1, %cst_12 {dimension_numbers = #tpu.dot_dimension_numbers<[1], [0], [0], [1], [0, 0, 1, 1], [], []>} : vector<2x32xf32>, vector<32x128xf32>, vector<2x128xf32> -> vector<2x128xf32>
    %15 = arith.addf %13, %14 : vector<2x128xf32>
    %16 = vector.extract_strided_slice %15 {offsets = [0, 0], sizes = [2, 32], strides = [1, 1]} : vector<2x128xf32> to vector<2x32xf32>
    %17 = arith.negf %16 : vector<2x32xf32>
    %18 = math.exp %17 : vector<2x32xf32>
    %cst_13 = arith.constant 1.000000e+00 : f32
    %19 = vector.broadcast %cst_13 : f32 to vector<2x32xf32>
    %20 = arith.addf %19, %18 : vector<2x32xf32>
    %21 = arith.divf %19, %20 : vector<2x32xf32>
    %22 = vector.extract_strided_slice %15 {offsets = [0, 32], sizes = [2, 32], strides = [1, 1]} : vector<2x128xf32> to vector<2x32xf32>
    %23 = arith.negf %22 : vector<2x32xf32>
    %24 = math.exp %23 : vector<2x32xf32>
    %cst_14 = arith.constant 1.000000e+00 : f32
    %25 = vector.broadcast %cst_14 : f32 to vector<2x32xf32>
    %26 = arith.addf %25, %24 : vector<2x32xf32>
    %27 = arith.divf %25, %26 : vector<2x32xf32>
    %28 = vector.extract_strided_slice %15 {offsets = [0, 64], sizes = [2, 32], strides = [1, 1]} : vector<2x128xf32> to vector<2x32xf32>
    %29 = math.tanh %28 : vector<2x32xf32>
    %30 = vector.extract_strided_slice %15 {offsets = [0, 96], sizes = [2, 32], strides = [1, 1]} : vector<2x128xf32> to vector<2x32xf32>
    %31 = arith.negf %30 : vector<2x32xf32>
    %32 = math.exp %31 : vector<2x32xf32>
    %cst_15 = arith.constant 1.000000e+00 : f32
    %33 = vector.broadcast %cst_15 : f32 to vector<2x32xf32>
    %34 = arith.addf %33, %32 : vector<2x32xf32>
    %35 = arith.divf %33, %34 : vector<2x32xf32>
    %36 = arith.mulf %27, %9 : vector<2x32xf32>
    %37 = arith.mulf %21, %29 : vector<2x32xf32>
    %38 = arith.addf %36, %37 : vector<2x32xf32>
    %39 = math.tanh %38 : vector<2x32xf32>
    %40 = arith.mulf %35, %39 : vector<2x32xf32>
    %41 = arith.index_cast %11 : i32 to index
    %c0_16 = arith.constant 0 : index
    %42 = vector.load %arg10[%41, %c0_16] : memref<16x32xf32, #tpu.memory_space<vmem>>, vector<2x32xf32>
    tpu.vector_store %arg10[%41, %c0_16], %40 {strides = array<i32>} : memref<16x32xf32, #tpu.memory_space<vmem>>, vector<2x32xf32>,
    %c1_i32 = arith.constant 1 : i32
    %c2_i32_17 = arith.constant 2 : i32
    %43 = arith.muli %c1_i32, %c2_i32_17 : i32
    %44 = tpu.assume_multiple %43, 2 : i32
    %45 = arith.index_cast %44 : i32 to index
    %c0_18 = arith.constant 0 : index
    %46 = vector.load %arg11[%45, %c0_18] : memref<16x128xf32, #tpu.memory_space<vmem>>, vector<2x128xf32>
    %cst_19 = arith.constant dense<0.000000e+00> : vector<2x128xf32>
    %47 = tpu.matmul %40, %1, %cst_19 {dimension_numbers = #tpu.dot_dimension_numbers<[1], [0], [0], [1], [0, 0, 1, 1], [], []>} : vector<2x32xf32>, vector<32x128xf32>, vector<2x128xf32> -> vector<2x128xf32>
    %48 = arith.addf %46, %47 : vector<2x128xf32>
    %49 = vector.extract_strided_slice %48 {offsets = [0, 0], sizes = [2, 32], strides = [1, 1]} : vector<2x128xf32> to vector<2x32xf32>
    %50 = arith.negf %49 : vector<2x32xf32>
    %51 = math.exp %50 : vector<2x32xf32>
    %cst_20 = arith.constant 1.000000e+00 : f32
    %52 = vector.broadcast %cst_20 : f32 to vector<2x32xf32>
    %53 = arith.addf %52, %51 : vector<2x32xf32>
    %54 = arith.divf %52, %53 : vector<2x32xf32>
    %55 = vector.extract_strided_slice %48 {offsets = [0, 32], sizes = [2, 32], strides = [1, 1]} : vector<2x128xf32> to vector<2x32xf32>
    %56 = arith.negf %55 : vector<2x32xf32>
    %57 = math.exp %56 : vector<2x32xf32>
    %cst_21 = arith.constant 1.000000e+00 : f32
    %58 = vector.broadcast %cst_21 : f32 to vector<2x32xf32>
    %59 = arith.addf %58, %57 : vector<2x32xf32>
    %60 = arith.divf %58, %59 : vector<2x32xf32>
    %61 = vector.extract_strided_slice %48 {offsets = [0, 64], sizes = [2, 32], strides = [1, 1]} : vector<2x128xf32> to vector<2x32xf32>
    %62 = math.tanh %61 : vector<2x32xf32>
    %63 = vector.extract_strided_slice %48 {offsets = [0, 96], sizes = [2, 32], strides = [1, 1]} : vector<2x128xf32> to vector<2x32xf32>
    %64 = arith.negf %63 : vector<2x32xf32>
    %65 = math.exp %64 : vector<2x32xf32>
    %cst_22 = arith.constant 1.000000e+00 : f32
    %66 = vector.broadcast %cst_22 : f32 to vector<2x32xf32>
    %67 = arith.addf %66, %65 : vector<2x32xf32>
    %68 = arith.divf %66, %67 : vector<2x32xf32>
    %69 = arith.mulf %60, %38 : vector<2x32xf32>
    %70 = arith.mulf %54, %62 : vector<2x32xf32>
    %71 = arith.addf %69, %70 : vector<2x32xf32>
    %72 = math.tanh %71 : vector<2x32xf32>
    %73 = arith.mulf %68, %72 : vector<2x32xf32>
    %74 = arith.index_cast %44 : i32 to index
    %c0_23 = arith.constant 0 : index
    %75 = vector.load %arg10[%74, %c0_23] : memref<16x32xf32, #tpu.memory_space<vmem>>, vector<2x32xf32>
    tpu.vector_store %arg10[%74, %c0_23], %73 {strides = array<i32>} : memref<16x32xf32, #tpu.memory_space<vmem>>, vector<2x32xf32>,
    %c2_i32_24 = arith.constant 2 : i32
    %c2_i32_25 = arith.constant 2 : i32
    %76 = arith.muli %c2_i32_24, %c2_i32_25 : i32
    %77 = tpu.assume_multiple %76, 2 : i32
    %78 = arith.index_cast %77 : i32 to index
    %c0_26 = arith.constant 0 : index
    %79 = vector.load %arg11[%78, %c0_26] : memref<16x128xf32, #tpu.memory_space<vmem>>, vector<2x128xf32>
    %cst_27 = arith.constant dense<0.000000e+00> : vector<2x128xf32>
    %80 = tpu.matmul %73, %1, %cst_27 {dimension_numbers = #tpu.dot_dimension_numbers<[1], [0], [0], [1], [0, 0, 1, 1], [], []>} : vector<2x32xf32>, vector<32x128xf32>, vector<2x128xf32> -> vector<2x128xf32>
    %81 = arith.addf %79, %80 : vector<2x128xf32>
    %82 = vector.extract_strided_slice %81 {offsets = [0, 0], sizes = [2, 32], strides = [1, 1]} : vector<2x128xf32> to vector<2x32xf32>
    %83 = arith.negf %82 : vector<2x32xf32>
    %84 = math.exp %83 : vector<2x32xf32>
    %cst_28 = arith.constant 1.000000e+00 : f32
    %85 = vector.broadcast %cst_28 : f32 to vector<2x32xf32>
    %86 = arith.addf %85, %84 : vector<2x32xf32>
    %87 = arith.divf %85, %86 : vector<2x32xf32>
    %88 = vector.extract_strided_slice %81 {offsets = [0, 32], sizes = [2, 32], strides = [1, 1]} : vector<2x128xf32> to vector<2x32xf32>
    %89 = arith.negf %88 : vector<2x32xf32>
    %90 = math.exp %89 : vector<2x32xf32>
    %cst_29 = arith.constant 1.000000e+00 : f32
    %91 = vector.broadcast %cst_29 : f32 to vector<2x32xf32>
    %92 = arith.addf %91, %90 : vector<2x32xf32>
    %93 = arith.divf %91, %92 : vector<2x32xf32>
    %94 = vector.extract_strided_slice %81 {offsets = [0, 64], sizes = [2, 32], strides = [1, 1]} : vector<2x128xf32> to vector<2x32xf32>
    %95 = math.tanh %94 : vector<2x32xf32>
    %96 = vector.extract_strided_slice %81 {offsets = [0, 96], sizes = [2, 32], strides = [1, 1]} : vector<2x128xf32> to vector<2x32xf32>
    %97 = arith.negf %96 : vector<2x32xf32>
    %98 = math.exp %97 : vector<2x32xf32>
    %cst_30 = arith.constant 1.000000e+00 : f32
    %99 = vector.broadcast %cst_30 : f32 to vector<2x32xf32>
    %100 = arith.addf %99, %98 : vector<2x32xf32>
    %101 = arith.divf %99, %100 : vector<2x32xf32>
    %102 = arith.mulf %93, %71 : vector<2x32xf32>
    %103 = arith.mulf %87, %95 : vector<2x32xf32>
    %104 = arith.addf %102, %103 : vector<2x32xf32>
    %105 = math.tanh %104 : vector<2x32xf32>
    %106 = arith.mulf %101, %105 : vector<2x32xf32>
    %107 = arith.index_cast %77 : i32 to index
    %c0_31 = arith.constant 0 : index
    %108 = vector.load %arg10[%107, %c0_31] : memref<16x32xf32, #tpu.memory_space<vmem>>, vector<2x32xf32>
    tpu.vector_store %arg10[%107, %c0_31], %106 {strides = array<i32>} : memref<16x32xf32, #tpu.memory_space<vmem>>, vector<2x32xf32>,
    %c3_i32 = arith.constant 3 : i32
    %c2_i32_32 = arith.constant 2 : i32
    %109 = arith.muli %c3_i32, %c2_i32_32 : i32
    %110 = tpu.assume_multiple %109, 2 : i32
    %111 = arith.index_cast %110 : i32 to index
    %c0_33 = arith.constant 0 : index
    %112 = vector.load %arg11[%111, %c0_33] : memref<16x128xf32, #tpu.memory_space<vmem>>, vector<2x128xf32>
    %cst_34 = arith.constant dense<0.000000e+00> : vector<2x128xf32>
    %113 = tpu.matmul %106, %1, %cst_34 {dimension_numbers = #tpu.dot_dimension_numbers<[1], [0], [0], [1], [0, 0, 1, 1], [], []>} : vector<2x32xf32>, vector<32x128xf32>, vector<2x128xf32> -> vector<2x128xf32>
    %114 = arith.addf %112, %113 : vector<2x128xf32>
    %115 = vector.extract_strided_slice %114 {offsets = [0, 0], sizes = [2, 32], strides = [1, 1]} : vector<2x128xf32> to vector<2x32xf32>
    %116 = arith.negf %115 : vector<2x32xf32>
    %117 = math.exp %116 : vector<2x32xf32>
    %cst_35 = arith.constant 1.000000e+00 : f32
    %118 = vector.broadcast %cst_35 : f32 to vector<2x32xf32>
    %119 = arith.addf %118, %117 : vector<2x32xf32>
    %120 = arith.divf %118, %119 : vector<2x32xf32>
    %121 = vector.extract_strided_slice %114 {offsets = [0, 32], sizes = [2, 32], strides = [1, 1]} : vector<2x128xf32> to vector<2x32xf32>
    %122 = arith.negf %121 : vector<2x32xf32>
    %123 = math.exp %122 : vector<2x32xf32>
    %cst_36 = arith.constant 1.000000e+00 : f32
    %124 = vector.broadcast %cst_36 : f32 to vector<2x32xf32>
    %125 = arith.addf %124, %123 : vector<2x32xf32>
    %126 = arith.divf %124, %125 : vector<2x32xf32>
    %127 = vector.extract_strided_slice %114 {offsets = [0, 64], sizes = [2, 32], strides = [1, 1]} : vector<2x128xf32> to vector<2x32xf32>
    %128 = math.tanh %127 : vector<2x32xf32>
    %129 = vector.extract_strided_slice %114 {offsets = [0, 96], sizes = [2, 32], strides = [1, 1]} : vector<2x128xf32> to vector<2x32xf32>
    %130 = arith.negf %129 : vector<2x32xf32>
    %131 = math.exp %130 : vector<2x32xf32>
    %cst_37 = arith.constant 1.000000e+00 : f32
    %132 = vector.broadcast %cst_37 : f32 to vector<2x32xf32>
    %133 = arith.addf %132, %131 : vector<2x32xf32>
    %134 = arith.divf %132, %133 : vector<2x32xf32>
    %135 = arith.mulf %126, %104 : vector<2x32xf32>
    %136 = arith.mulf %120, %128 : vector<2x32xf32>
    %137 = arith.addf %135, %136 : vector<2x32xf32>
    %138 = math.tanh %137 : vector<2x32xf32>
    %139 = arith.mulf %134, %138 : vector<2x32xf32>
    %140 = arith.index_cast %110 : i32 to index
    %c0_38 = arith.constant 0 : index
    %141 = vector.load %arg10[%140, %c0_38] : memref<16x32xf32, #tpu.memory_space<vmem>>, vector<2x32xf32>
    tpu.vector_store %arg10[%140, %c0_38], %139 {strides = array<i32>} : memref<16x32xf32, #tpu.memory_space<vmem>>, vector<2x32xf32>,
    %c4_i32 = arith.constant 4 : i32
    %c2_i32_39 = arith.constant 2 : i32
    %142 = arith.muli %c4_i32, %c2_i32_39 : i32
    %143 = tpu.assume_multiple %142, 2 : i32
    %144 = arith.index_cast %143 : i32 to index
    %c0_40 = arith.constant 0 : index
    %145 = vector.load %arg11[%144, %c0_40] : memref<16x128xf32, #tpu.memory_space<vmem>>, vector<2x128xf32>
    %cst_41 = arith.constant dense<0.000000e+00> : vector<2x128xf32>
    %146 = tpu.matmul %139, %1, %cst_41 {dimension_numbers = #tpu.dot_dimension_numbers<[1], [0], [0], [1], [0, 0, 1, 1], [], []>} : vector<2x32xf32>, vector<32x128xf32>, vector<2x128xf32> -> vector<2x128xf32>
    %147 = arith.addf %145, %146 : vector<2x128xf32>
    %148 = vector.extract_strided_slice %147 {offsets = [0, 0], sizes = [2, 32], strides = [1, 1]} : vector<2x128xf32> to vector<2x32xf32>
    %149 = arith.negf %148 : vector<2x32xf32>
    %150 = math.exp %149 : vector<2x32xf32>
    %cst_42 = arith.constant 1.000000e+00 : f32
    %151 = vector.broadcast %cst_42 : f32 to vector<2x32xf32>
    %152 = arith.addf %151, %150 : vector<2x32xf32>
    %153 = arith.divf %151, %152 : vector<2x32xf32>
    %154 = vector.extract_strided_slice %147 {offsets = [0, 32], sizes = [2, 32], strides = [1, 1]} : vector<2x128xf32> to vector<2x32xf32>
    %155 = arith.negf %154 : vector<2x32xf32>
    %156 = math.exp %155 : vector<2x32xf32>
    %cst_43 = arith.constant 1.000000e+00 : f32
    %157 = vector.broadcast %cst_43 : f32 to vector<2x32xf32>
    %158 = arith.addf %157, %156 : vector<2x32xf32>
    %159 = arith.divf %157, %158 : vector<2x32xf32>
    %160 = vector.extract_strided_slice %147 {offsets = [0, 64], sizes = [2, 32], strides = [1, 1]} : vector<2x128xf32> to vector<2x32xf32>
    %161 = math.tanh %160 : vector<2x32xf32>
    %162 = vector.extract_strided_slice %147 {offsets = [0, 96], sizes = [2, 32], strides = [1, 1]} : vector<2x128xf32> to vector<2x32xf32>
    %163 = arith.negf %162 : vector<2x32xf32>
    %164 = math.exp %163 : vector<2x32xf32>
    %cst_44 = arith.constant 1.000000e+00 : f32
    %165 = vector.broadcast %cst_44 : f32 to vector<2x32xf32>
    %166 = arith.addf %165, %164 : vector<2x32xf32>
    %167 = arith.divf %165, %166 : vector<2x32xf32>
    %168 = arith.mulf %159, %137 : vector<2x32xf32>
    %169 = arith.mulf %153, %161 : vector<2x32xf32>
    %170 = arith.addf %168, %169 : vector<2x32xf32>
    %171 = math.tanh %170 : vector<2x32xf32>
    %172 = arith.mulf %167, %171 : vector<2x32xf32>
    %173 = arith.index_cast %143 : i32 to index
    %c0_45 = arith.constant 0 : index
    %174 = vector.load %arg10[%173, %c0_45] : memref<16x32xf32, #tpu.memory_space<vmem>>, vector<2x32xf32>
    tpu.vector_store %arg10[%173, %c0_45], %172 {strides = array<i32>} : memref<16x32xf32, #tpu.memory_space<vmem>>, vector<2x32xf32>,
    %c5_i32 = arith.constant 5 : i32
    %c2_i32_46 = arith.constant 2 : i32
    %175 = arith.muli %c5_i32, %c2_i32_46 : i32
    %176 = tpu.assume_multiple %175, 2 : i32
    %177 = arith.index_cast %176 : i32 to index
    %c0_47 = arith.constant 0 : index
    %178 = vector.load %arg11[%177, %c0_47] : memref<16x128xf32, #tpu.memory_space<vmem>>, vector<2x128xf32>
    %cst_48 = arith.constant dense<0.000000e+00> : vector<2x128xf32>
    %179 = tpu.matmul %172, %1, %cst_48 {dimension_numbers = #tpu.dot_dimension_numbers<[1], [0], [0], [1], [0, 0, 1, 1], [], []>} : vector<2x32xf32>, vector<32x128xf32>, vector<2x128xf32> -> vector<2x128xf32>
    %180 = arith.addf %178, %179 : vector<2x128xf32>
    %181 = vector.extract_strided_slice %180 {offsets = [0, 0], sizes = [2, 32], strides = [1, 1]} : vector<2x128xf32> to vector<2x32xf32>
    %182 = arith.negf %181 : vector<2x32xf32>
    %183 = math.exp %182 : vector<2x32xf32>
    %cst_49 = arith.constant 1.000000e+00 : f32
    %184 = vector.broadcast %cst_49 : f32 to vector<2x32xf32>
    %185 = arith.addf %184, %183 : vector<2x32xf32>
    %186 = arith.divf %184, %185 : vector<2x32xf32>
    %187 = vector.extract_strided_slice %180 {offsets = [0, 32], sizes = [2, 32], strides = [1, 1]} : vector<2x128xf32> to vector<2x32xf32>
    %188 = arith.negf %187 : vector<2x32xf32>
    %189 = math.exp %188 : vector<2x32xf32>
    %cst_50 = arith.constant 1.000000e+00 : f32
    %190 = vector.broadcast %cst_50 : f32 to vector<2x32xf32>
    %191 = arith.addf %190, %189 : vector<2x32xf32>
    %192 = arith.divf %190, %191 : vector<2x32xf32>
    %193 = vector.extract_strided_slice %180 {offsets = [0, 64], sizes = [2, 32], strides = [1, 1]} : vector<2x128xf32> to vector<2x32xf32>
    %194 = math.tanh %193 : vector<2x32xf32>
    %195 = vector.extract_strided_slice %180 {offsets = [0, 96], sizes = [2, 32], strides = [1, 1]} : vector<2x128xf32> to vector<2x32xf32>
    %196 = arith.negf %195 : vector<2x32xf32>
    %197 = math.exp %196 : vector<2x32xf32>
    %cst_51 = arith.constant 1.000000e+00 : f32
    %198 = vector.broadcast %cst_51 : f32 to vector<2x32xf32>
    %199 = arith.addf %198, %197 : vector<2x32xf32>
    %200 = arith.divf %198, %199 : vector<2x32xf32>
    %201 = arith.mulf %192, %170 : vector<2x32xf32>
    %202 = arith.mulf %186, %194 : vector<2x32xf32>
    %203 = arith.addf %201, %202 : vector<2x32xf32>
    %204 = math.tanh %203 : vector<2x32xf32>
    %205 = arith.mulf %200, %204 : vector<2x32xf32>
    %206 = arith.index_cast %176 : i32 to index
    %c0_52 = arith.constant 0 : index
    %207 = vector.load %arg10[%206, %c0_52] : memref<16x32xf32, #tpu.memory_space<vmem>>, vector<2x32xf32>
    tpu.vector_store %arg10[%206, %c0_52], %205 {strides = array<i32>} : memref<16x32xf32, #tpu.memory_space<vmem>>, vector<2x32xf32>,
    %c6_i32 = arith.constant 6 : i32
    %c2_i32_53 = arith.constant 2 : i32
    %208 = arith.muli %c6_i32, %c2_i32_53 : i32
    %209 = tpu.assume_multiple %208, 2 : i32
    %210 = arith.index_cast %209 : i32 to index
    %c0_54 = arith.constant 0 : index
    %211 = vector.load %arg11[%210, %c0_54] : memref<16x128xf32, #tpu.memory_space<vmem>>, vector<2x128xf32>
    %cst_55 = arith.constant dense<0.000000e+00> : vector<2x128xf32>
    %212 = tpu.matmul %205, %1, %cst_55 {dimension_numbers = #tpu.dot_dimension_numbers<[1], [0], [0], [1], [0, 0, 1, 1], [], []>} : vector<2x32xf32>, vector<32x128xf32>, vector<2x128xf32> -> vector<2x128xf32>
    %213 = arith.addf %211, %212 : vector<2x128xf32>
    %214 = vector.extract_strided_slice %213 {offsets = [0, 0], sizes = [2, 32], strides = [1, 1]} : vector<2x128xf32> to vector<2x32xf32>
    %215 = arith.negf %214 : vector<2x32xf32>
    %216 = math.exp %215 : vector<2x32xf32>
    %cst_56 = arith.constant 1.000000e+00 : f32
    %217 = vector.broadcast %cst_56 : f32 to vector<2x32xf32>
    %218 = arith.addf %217, %216 : vector<2x32xf32>
    %219 = arith.divf %217, %218 : vector<2x32xf32>
    %220 = vector.extract_strided_slice %213 {offsets = [0, 32], sizes = [2, 32], strides = [1, 1]} : vector<2x128xf32> to vector<2x32xf32>
    %221 = arith.negf %220 : vector<2x32xf32>
    %222 = math.exp %221 : vector<2x32xf32>
    %cst_57 = arith.constant 1.000000e+00 : f32
    %223 = vector.broadcast %cst_57 : f32 to vector<2x32xf32>
    %224 = arith.addf %223, %222 : vector<2x32xf32>
    %225 = arith.divf %223, %224 : vector<2x32xf32>
    %226 = vector.extract_strided_slice %213 {offsets = [0, 64], sizes = [2, 32], strides = [1, 1]} : vector<2x128xf32> to vector<2x32xf32>
    %227 = math.tanh %226 : vector<2x32xf32>
    %228 = vector.extract_strided_slice %213 {offsets = [0, 96], sizes = [2, 32], strides = [1, 1]} : vector<2x128xf32> to vector<2x32xf32>
    %229 = arith.negf %228 : vector<2x32xf32>
    %230 = math.exp %229 : vector<2x32xf32>
    %cst_58 = arith.constant 1.000000e+00 : f32
    %231 = vector.broadcast %cst_58 : f32 to vector<2x32xf32>
    %232 = arith.addf %231, %230 : vector<2x32xf32>
    %233 = arith.divf %231, %232 : vector<2x32xf32>
    %234 = arith.mulf %225, %203 : vector<2x32xf32>
    %235 = arith.mulf %219, %227 : vector<2x32xf32>
    %236 = arith.addf %234, %235 : vector<2x32xf32>
    %237 = math.tanh %236 : vector<2x32xf32>
    %238 = arith.mulf %233, %237 : vector<2x32xf32>
    %239 = arith.index_cast %209 : i32 to index
    %c0_59 = arith.constant 0 : index
    %240 = vector.load %arg10[%239, %c0_59] : memref<16x32xf32, #tpu.memory_space<vmem>>, vector<2x32xf32>
    tpu.vector_store %arg10[%239, %c0_59], %238 {strides = array<i32>} : memref<16x32xf32, #tpu.memory_space<vmem>>, vector<2x32xf32>,
    %c7_i32 = arith.constant 7 : i32
    %c2_i32_60 = arith.constant 2 : i32
    %241 = arith.muli %c7_i32, %c2_i32_60 : i32
    %242 = tpu.assume_multiple %241, 2 : i32
    %243 = arith.index_cast %242 : i32 to index
    %c0_61 = arith.constant 0 : index
    %244 = vector.load %arg11[%243, %c0_61] : memref<16x128xf32, #tpu.memory_space<vmem>>, vector<2x128xf32>
    %cst_62 = arith.constant dense<0.000000e+00> : vector<2x128xf32>
    %245 = tpu.matmul %238, %1, %cst_62 {dimension_numbers = #tpu.dot_dimension_numbers<[1], [0], [0], [1], [0, 0, 1, 1], [], []>} : vector<2x32xf32>, vector<32x128xf32>, vector<2x128xf32> -> vector<2x128xf32>
    %246 = arith.addf %244, %245 : vector<2x128xf32>
    %247 = vector.extract_strided_slice %246 {offsets = [0, 0], sizes = [2, 32], strides = [1, 1]} : vector<2x128xf32> to vector<2x32xf32>
    %248 = arith.negf %247 : vector<2x32xf32>
    %249 = math.exp %248 : vector<2x32xf32>
    %cst_63 = arith.constant 1.000000e+00 : f32
    %250 = vector.broadcast %cst_63 : f32 to vector<2x32xf32>
    %251 = arith.addf %250, %249 : vector<2x32xf32>
    %252 = arith.divf %250, %251 : vector<2x32xf32>
    %253 = vector.extract_strided_slice %246 {offsets = [0, 32], sizes = [2, 32], strides = [1, 1]} : vector<2x128xf32> to vector<2x32xf32>
    %254 = arith.negf %253 : vector<2x32xf32>
    %255 = math.exp %254 : vector<2x32xf32>
    %cst_64 = arith.constant 1.000000e+00 : f32
    %256 = vector.broadcast %cst_64 : f32 to vector<2x32xf32>
    %257 = arith.addf %256, %255 : vector<2x32xf32>
    %258 = arith.divf %256, %257 : vector<2x32xf32>
    %259 = vector.extract_strided_slice %246 {offsets = [0, 64], sizes = [2, 32], strides = [1, 1]} : vector<2x128xf32> to vector<2x32xf32>
    %260 = math.tanh %259 : vector<2x32xf32>
    %261 = vector.extract_strided_slice %246 {offsets = [0, 96], sizes = [2, 32], strides = [1, 1]} : vector<2x128xf32> to vector<2x32xf32>
    %262 = arith.negf %261 : vector<2x32xf32>
    %263 = math.exp %262 : vector<2x32xf32>
    %cst_65 = arith.constant 1.000000e+00 : f32
    %264 = vector.broadcast %cst_65 : f32 to vector<2x32xf32>
    %265 = arith.addf %264, %263 : vector<2x32xf32>
    %266 = arith.divf %264, %265 : vector<2x32xf32>
    %267 = arith.mulf %258, %236 : vector<2x32xf32>
    %268 = arith.mulf %252, %260 : vector<2x32xf32>
    %269 = arith.addf %267, %268 : vector<2x32xf32>
    %270 = math.tanh %269 : vector<2x32xf32>
    %271 = arith.mulf %266, %270 : vector<2x32xf32>
    %272 = arith.index_cast %242 : i32 to index
    %c0_66 = arith.constant 0 : index
    %273 = vector.load %arg10[%272, %c0_66] : memref<16x32xf32, #tpu.memory_space<vmem>>, vector<2x32xf32>
    tpu.vector_store %arg10[%272, %c0_66], %271 {strides = array<i32>} : memref<16x32xf32, #tpu.memory_space<vmem>>, vector<2x32xf32>,
    %c8_i32 = arith.constant 8 : i32
    %c0_67 = arith.constant 0 : index
    %c0_68 = arith.constant 0 : index
    %274 = vector.load %arg4[%c0_67, %c0_68] : memref<32x128xf32, #tpu.memory_space<vmem>>, vector<32x128xf32>
    %c0_69 = arith.constant 0 : index
    %c0_70 = arith.constant 0 : index
    %275 = vector.load %arg5[%c0_69, %c0_70] : memref<32x128xf32, #tpu.memory_space<vmem>>, vector<32x128xf32>
    %c0_71 = arith.constant 0 : index
    %c0_72 = arith.constant 0 : index
    %276 = vector.load %arg6[%c0_71, %c0_72] : memref<1x128xf32, #tpu.memory_space<vmem>>, vector<1x128xf32>
    %c0_73 = arith.constant 0 : index
    %c0_74 = arith.constant 0 : index
    %277 = vector.load %arg10[%c0_73, %c0_74] : memref<16x32xf32, #tpu.memory_space<vmem>>, vector<16x32xf32>
    %cst_75 = arith.constant dense<0.000000e+00> : vector<16x128xf32>
    %278 = tpu.matmul %277, %274, %cst_75 {dimension_numbers = #tpu.dot_dimension_numbers<[1], [0], [0], [1], [0, 0, 1, 1], [], []>} : vector<16x32xf32>, vector<32x128xf32>, vector<16x128xf32> -> vector<16x128xf32>
    %279 = vector.broadcast %276 : vector<1x128xf32> to vector<16x128xf32>
    %280 = arith.addf %278, %279 : vector<16x128xf32>
    %c0_76 = arith.constant 0 : index
    %c0_77 = arith.constant 0 : index
    %281 = vector.load %arg11[%c0_76, %c0_77] : memref<16x128xf32, #tpu.memory_space<vmem>>, vector<16x128xf32>
    tpu.vector_store %arg11[%c0_76, %c0_77], %280 {strides = array<i32>} : memref<16x128xf32, #tpu.memory_space<vmem>>, vector<16x128xf32>,
    %cst_78 = arith.constant 0.000000e+00 : f32
    %282 = vector.broadcast %cst_78 : f32 to vector<2x32xf32>
    %cst_79 = arith.constant 0.000000e+00 : f32
    %283 = vector.broadcast %cst_79 : f32 to vector<2x32xf32>
    %c0_i32_80 = arith.constant 0 : i32
    %c2_i32_81 = arith.constant 2 : i32
    %284 = arith.muli %c0_i32_80, %c2_i32_81 : i32
    %285 = tpu.assume_multiple %284, 2 : i32
    %286 = arith.index_cast %285 : i32 to index
    %c0_82 = arith.constant 0 : index
    %287 = vector.load %arg11[%286, %c0_82] : memref<16x128xf32, #tpu.memory_space<vmem>>, vector<2x128xf32>
    %cst_83 = arith.constant dense<0.000000e+00> : vector<2x128xf32>
    %288 = tpu.matmul %282, %275, %cst_83 {dimension_numbers = #tpu.dot_dimension_numbers<[1], [0], [0], [1], [0, 0, 1, 1], [], []>} : vector<2x32xf32>, vector<32x128xf32>, vector<2x128xf32> -> vector<2x128xf32>
    %289 = arith.addf %287, %288 : vector<2x128xf32>
    %290 = vector.extract_strided_slice %289 {offsets = [0, 0], sizes = [2, 32], strides = [1, 1]} : vector<2x128xf32> to vector<2x32xf32>
    %291 = arith.negf %290 : vector<2x32xf32>
    %292 = math.exp %291 : vector<2x32xf32>
    %cst_84 = arith.constant 1.000000e+00 : f32
    %293 = vector.broadcast %cst_84 : f32 to vector<2x32xf32>
    %294 = arith.addf %293, %292 : vector<2x32xf32>
    %295 = arith.divf %293, %294 : vector<2x32xf32>
    %296 = vector.extract_strided_slice %289 {offsets = [0, 32], sizes = [2, 32], strides = [1, 1]} : vector<2x128xf32> to vector<2x32xf32>
    %297 = arith.negf %296 : vector<2x32xf32>
    %298 = math.exp %297 : vector<2x32xf32>
    %cst_85 = arith.constant 1.000000e+00 : f32
    %299 = vector.broadcast %cst_85 : f32 to vector<2x32xf32>
    %300 = arith.addf %299, %298 : vector<2x32xf32>
    %301 = arith.divf %299, %300 : vector<2x32xf32>
    %302 = vector.extract_strided_slice %289 {offsets = [0, 64], sizes = [2, 32], strides = [1, 1]} : vector<2x128xf32> to vector<2x32xf32>
    %303 = math.tanh %302 : vector<2x32xf32>
    %304 = vector.extract_strided_slice %289 {offsets = [0, 96], sizes = [2, 32], strides = [1, 1]} : vector<2x128xf32> to vector<2x32xf32>
    %305 = arith.negf %304 : vector<2x32xf32>
    %306 = math.exp %305 : vector<2x32xf32>
    %cst_86 = arith.constant 1.000000e+00 : f32
    %307 = vector.broadcast %cst_86 : f32 to vector<2x32xf32>
    %308 = arith.addf %307, %306 : vector<2x32xf32>
    %309 = arith.divf %307, %308 : vector<2x32xf32>
    %310 = arith.mulf %301, %283 : vector<2x32xf32>
    %311 = arith.mulf %295, %303 : vector<2x32xf32>
    %312 = arith.addf %310, %311 : vector<2x32xf32>
    %313 = math.tanh %312 : vector<2x32xf32>
    %314 = arith.mulf %309, %313 : vector<2x32xf32>
    %315 = arith.index_cast %285 : i32 to index
    %c0_87 = arith.constant 0 : index
    %316 = vector.load %arg10[%315, %c0_87] : memref<16x32xf32, #tpu.memory_space<vmem>>, vector<2x32xf32>
    tpu.vector_store %arg10[%315, %c0_87], %314 {strides = array<i32>} : memref<16x32xf32, #tpu.memory_space<vmem>>, vector<2x32xf32>,
    %c1_i32_88 = arith.constant 1 : i32
    %c2_i32_89 = arith.constant 2 : i32
    %317 = arith.muli %c1_i32_88, %c2_i32_89 : i32
    %318 = tpu.assume_multiple %317, 2 : i32
    %319 = arith.index_cast %318 : i32 to index
    %c0_90 = arith.constant 0 : index
    %320 = vector.load %arg11[%319, %c0_90] : memref<16x128xf32, #tpu.memory_space<vmem>>, vector<2x128xf32>
    %cst_91 = arith.constant dense<0.000000e+00> : vector<2x128xf32>
    %321 = tpu.matmul %314, %275, %cst_91 {dimension_numbers = #tpu.dot_dimension_numbers<[1], [0], [0], [1], [0, 0, 1, 1], [], []>} : vector<2x32xf32>, vector<32x128xf32>, vector<2x128xf32> -> vector<2x128xf32>
    %322 = arith.addf %320, %321 : vector<2x128xf32>
    %323 = vector.extract_strided_slice %322 {offsets = [0, 0], sizes = [2, 32], strides = [1, 1]} : vector<2x128xf32> to vector<2x32xf32>
    %324 = arith.negf %323 : vector<2x32xf32>
    %325 = math.exp %324 : vector<2x32xf32>
    %cst_92 = arith.constant 1.000000e+00 : f32
    %326 = vector.broadcast %cst_92 : f32 to vector<2x32xf32>
    %327 = arith.addf %326, %325 : vector<2x32xf32>
    %328 = arith.divf %326, %327 : vector<2x32xf32>
    %329 = vector.extract_strided_slice %322 {offsets = [0, 32], sizes = [2, 32], strides = [1, 1]} : vector<2x128xf32> to vector<2x32xf32>
    %330 = arith.negf %329 : vector<2x32xf32>
    %331 = math.exp %330 : vector<2x32xf32>
    %cst_93 = arith.constant 1.000000e+00 : f32
    %332 = vector.broadcast %cst_93 : f32 to vector<2x32xf32>
    %333 = arith.addf %332, %331 : vector<2x32xf32>
    %334 = arith.divf %332, %333 : vector<2x32xf32>
    %335 = vector.extract_strided_slice %322 {offsets = [0, 64], sizes = [2, 32], strides = [1, 1]} : vector<2x128xf32> to vector<2x32xf32>
    %336 = math.tanh %335 : vector<2x32xf32>
    %337 = vector.extract_strided_slice %322 {offsets = [0, 96], sizes = [2, 32], strides = [1, 1]} : vector<2x128xf32> to vector<2x32xf32>
    %338 = arith.negf %337 : vector<2x32xf32>
    %339 = math.exp %338 : vector<2x32xf32>
    %cst_94 = arith.constant 1.000000e+00 : f32
    %340 = vector.broadcast %cst_94 : f32 to vector<2x32xf32>
    %341 = arith.addf %340, %339 : vector<2x32xf32>
    %342 = arith.divf %340, %341 : vector<2x32xf32>
    %343 = arith.mulf %334, %312 : vector<2x32xf32>
    %344 = arith.mulf %328, %336 : vector<2x32xf32>
    %345 = arith.addf %343, %344 : vector<2x32xf32>
    %346 = math.tanh %345 : vector<2x32xf32>
    %347 = arith.mulf %342, %346 : vector<2x32xf32>
    %348 = arith.index_cast %318 : i32 to index
    %c0_95 = arith.constant 0 : index
    %349 = vector.load %arg10[%348, %c0_95] : memref<16x32xf32, #tpu.memory_space<vmem>>, vector<2x32xf32>
    tpu.vector_store %arg10[%348, %c0_95], %347 {strides = array<i32>} : memref<16x32xf32, #tpu.memory_space<vmem>>, vector<2x32xf32>,
    %c2_i32_96 = arith.constant 2 : i32
    %c2_i32_97 = arith.constant 2 : i32
    %350 = arith.muli %c2_i32_96, %c2_i32_97 : i32
    %351 = tpu.assume_multiple %350, 2 : i32
    %352 = arith.index_cast %351 : i32 to index
    %c0_98 = arith.constant 0 : index
    %353 = vector.load %arg11[%352, %c0_98] : memref<16x128xf32, #tpu.memory_space<vmem>>, vector<2x128xf32>
    %cst_99 = arith.constant dense<0.000000e+00> : vector<2x128xf32>
    %354 = tpu.matmul %347, %275, %cst_99 {dimension_numbers = #tpu.dot_dimension_numbers<[1], [0], [0], [1], [0, 0, 1, 1], [], []>} : vector<2x32xf32>, vector<32x128xf32>, vector<2x128xf32> -> vector<2x128xf32>
    %355 = arith.addf %353, %354 : vector<2x128xf32>
    %356 = vector.extract_strided_slice %355 {offsets = [0, 0], sizes = [2, 32], strides = [1, 1]} : vector<2x128xf32> to vector<2x32xf32>
    %357 = arith.negf %356 : vector<2x32xf32>
    %358 = math.exp %357 : vector<2x32xf32>
    %cst_100 = arith.constant 1.000000e+00 : f32
    %359 = vector.broadcast %cst_100 : f32 to vector<2x32xf32>
    %360 = arith.addf %359, %358 : vector<2x32xf32>
    %361 = arith.divf %359, %360 : vector<2x32xf32>
    %362 = vector.extract_strided_slice %355 {offsets = [0, 32], sizes = [2, 32], strides = [1, 1]} : vector<2x128xf32> to vector<2x32xf32>
    %363 = arith.negf %362 : vector<2x32xf32>
    %364 = math.exp %363 : vector<2x32xf32>
    %cst_101 = arith.constant 1.000000e+00 : f32
    %365 = vector.broadcast %cst_101 : f32 to vector<2x32xf32>
    %366 = arith.addf %365, %364 : vector<2x32xf32>
    %367 = arith.divf %365, %366 : vector<2x32xf32>
    %368 = vector.extract_strided_slice %355 {offsets = [0, 64], sizes = [2, 32], strides = [1, 1]} : vector<2x128xf32> to vector<2x32xf32>
    %369 = math.tanh %368 : vector<2x32xf32>
    %370 = vector.extract_strided_slice %355 {offsets = [0, 96], sizes = [2, 32], strides = [1, 1]} : vector<2x128xf32> to vector<2x32xf32>
    %371 = arith.negf %370 : vector<2x32xf32>
    %372 = math.exp %371 : vector<2x32xf32>
    %cst_102 = arith.constant 1.000000e+00 : f32
    %373 = vector.broadcast %cst_102 : f32 to vector<2x32xf32>
    %374 = arith.addf %373, %372 : vector<2x32xf32>
    %375 = arith.divf %373, %374 : vector<2x32xf32>
    %376 = arith.mulf %367, %345 : vector<2x32xf32>
    %377 = arith.mulf %361, %369 : vector<2x32xf32>
    %378 = arith.addf %376, %377 : vector<2x32xf32>
    %379 = math.tanh %378 : vector<2x32xf32>
    %380 = arith.mulf %375, %379 : vector<2x32xf32>
    %381 = arith.index_cast %351 : i32 to index
    %c0_103 = arith.constant 0 : index
    %382 = vector.load %arg10[%381, %c0_103] : memref<16x32xf32, #tpu.memory_space<vmem>>, vector<2x32xf32>
    tpu.vector_store %arg10[%381, %c0_103], %380 {strides = array<i32>} : memref<16x32xf32, #tpu.memory_space<vmem>>, vector<2x32xf32>,
    %c3_i32_104 = arith.constant 3 : i32
    %c2_i32_105 = arith.constant 2 : i32
    %383 = arith.muli %c3_i32_104, %c2_i32_105 : i32
    %384 = tpu.assume_multiple %383, 2 : i32
    %385 = arith.index_cast %384 : i32 to index
    %c0_106 = arith.constant 0 : index
    %386 = vector.load %arg11[%385, %c0_106] : memref<16x128xf32, #tpu.memory_space<vmem>>, vector<2x128xf32>
    %cst_107 = arith.constant dense<0.000000e+00> : vector<2x128xf32>
    %387 = tpu.matmul %380, %275, %cst_107 {dimension_numbers = #tpu.dot_dimension_numbers<[1], [0], [0], [1], [0, 0, 1, 1], [], []>} : vector<2x32xf32>, vector<32x128xf32>, vector<2x128xf32> -> vector<2x128xf32>
    %388 = arith.addf %386, %387 : vector<2x128xf32>
    %389 = vector.extract_strided_slice %388 {offsets = [0, 0], sizes = [2, 32], strides = [1, 1]} : vector<2x128xf32> to vector<2x32xf32>
    %390 = arith.negf %389 : vector<2x32xf32>
    %391 = math.exp %390 : vector<2x32xf32>
    %cst_108 = arith.constant 1.000000e+00 : f32
    %392 = vector.broadcast %cst_108 : f32 to vector<2x32xf32>
    %393 = arith.addf %392, %391 : vector<2x32xf32>
    %394 = arith.divf %392, %393 : vector<2x32xf32>
    %395 = vector.extract_strided_slice %388 {offsets = [0, 32], sizes = [2, 32], strides = [1, 1]} : vector<2x128xf32> to vector<2x32xf32>
    %396 = arith.negf %395 : vector<2x32xf32>
    %397 = math.exp %396 : vector<2x32xf32>
    %cst_109 = arith.constant 1.000000e+00 : f32
    %398 = vector.broadcast %cst_109 : f32 to vector<2x32xf32>
    %399 = arith.addf %398, %397 : vector<2x32xf32>
    %400 = arith.divf %398, %399 : vector<2x32xf32>
    %401 = vector.extract_strided_slice %388 {offsets = [0, 64], sizes = [2, 32], strides = [1, 1]} : vector<2x128xf32> to vector<2x32xf32>
    %402 = math.tanh %401 : vector<2x32xf32>
    %403 = vector.extract_strided_slice %388 {offsets = [0, 96], sizes = [2, 32], strides = [1, 1]} : vector<2x128xf32> to vector<2x32xf32>
    %404 = arith.negf %403 : vector<2x32xf32>
    %405 = math.exp %404 : vector<2x32xf32>
    %cst_110 = arith.constant 1.000000e+00 : f32
    %406 = vector.broadcast %cst_110 : f32 to vector<2x32xf32>
    %407 = arith.addf %406, %405 : vector<2x32xf32>
    %408 = arith.divf %406, %407 : vector<2x32xf32>
    %409 = arith.mulf %400, %378 : vector<2x32xf32>
    %410 = arith.mulf %394, %402 : vector<2x32xf32>
    %411 = arith.addf %409, %410 : vector<2x32xf32>
    %412 = math.tanh %411 : vector<2x32xf32>
    %413 = arith.mulf %408, %412 : vector<2x32xf32>
    %414 = arith.index_cast %384 : i32 to index
    %c0_111 = arith.constant 0 : index
    %415 = vector.load %arg10[%414, %c0_111] : memref<16x32xf32, #tpu.memory_space<vmem>>, vector<2x32xf32>
    tpu.vector_store %arg10[%414, %c0_111], %413 {strides = array<i32>} : memref<16x32xf32, #tpu.memory_space<vmem>>, vector<2x32xf32>,
    %c4_i32_112 = arith.constant 4 : i32
    %c2_i32_113 = arith.constant 2 : i32
    %416 = arith.muli %c4_i32_112, %c2_i32_113 : i32
    %417 = tpu.assume_multiple %416, 2 : i32
    %418 = arith.index_cast %417 : i32 to index
    %c0_114 = arith.constant 0 : index
    %419 = vector.load %arg11[%418, %c0_114] : memref<16x128xf32, #tpu.memory_space<vmem>>, vector<2x128xf32>
    %cst_115 = arith.constant dense<0.000000e+00> : vector<2x128xf32>
    %420 = tpu.matmul %413, %275, %cst_115 {dimension_numbers = #tpu.dot_dimension_numbers<[1], [0], [0], [1], [0, 0, 1, 1], [], []>} : vector<2x32xf32>, vector<32x128xf32>, vector<2x128xf32> -> vector<2x128xf32>
    %421 = arith.addf %419, %420 : vector<2x128xf32>
    %422 = vector.extract_strided_slice %421 {offsets = [0, 0], sizes = [2, 32], strides = [1, 1]} : vector<2x128xf32> to vector<2x32xf32>
    %423 = arith.negf %422 : vector<2x32xf32>
    %424 = math.exp %423 : vector<2x32xf32>
    %cst_116 = arith.constant 1.000000e+00 : f32
    %425 = vector.broadcast %cst_116 : f32 to vector<2x32xf32>
    %426 = arith.addf %425, %424 : vector<2x32xf32>
    %427 = arith.divf %425, %426 : vector<2x32xf32>
    %428 = vector.extract_strided_slice %421 {offsets = [0, 32], sizes = [2, 32], strides = [1, 1]} : vector<2x128xf32> to vector<2x32xf32>
    %429 = arith.negf %428 : vector<2x32xf32>
    %430 = math.exp %429 : vector<2x32xf32>
    %cst_117 = arith.constant 1.000000e+00 : f32
    %431 = vector.broadcast %cst_117 : f32 to vector<2x32xf32>
    %432 = arith.addf %431, %430 : vector<2x32xf32>
    %433 = arith.divf %431, %432 : vector<2x32xf32>
    %434 = vector.extract_strided_slice %421 {offsets = [0, 64], sizes = [2, 32], strides = [1, 1]} : vector<2x128xf32> to vector<2x32xf32>
    %435 = math.tanh %434 : vector<2x32xf32>
    %436 = vector.extract_strided_slice %421 {offsets = [0, 96], sizes = [2, 32], strides = [1, 1]} : vector<2x128xf32> to vector<2x32xf32>
    %437 = arith.negf %436 : vector<2x32xf32>
    %438 = math.exp %437 : vector<2x32xf32>
    %cst_118 = arith.constant 1.000000e+00 : f32
    %439 = vector.broadcast %cst_118 : f32 to vector<2x32xf32>
    %440 = arith.addf %439, %438 : vector<2x32xf32>
    %441 = arith.divf %439, %440 : vector<2x32xf32>
    %442 = arith.mulf %433, %411 : vector<2x32xf32>
    %443 = arith.mulf %427, %435 : vector<2x32xf32>
    %444 = arith.addf %442, %443 : vector<2x32xf32>
    %445 = math.tanh %444 : vector<2x32xf32>
    %446 = arith.mulf %441, %445 : vector<2x32xf32>
    %447 = arith.index_cast %417 : i32 to index
    %c0_119 = arith.constant 0 : index
    %448 = vector.load %arg10[%447, %c0_119] : memref<16x32xf32, #tpu.memory_space<vmem>>, vector<2x32xf32>
    tpu.vector_store %arg10[%447, %c0_119], %446 {strides = array<i32>} : memref<16x32xf32, #tpu.memory_space<vmem>>, vector<2x32xf32>,
    %c5_i32_120 = arith.constant 5 : i32
    %c2_i32_121 = arith.constant 2 : i32
    %449 = arith.muli %c5_i32_120, %c2_i32_121 : i32
    %450 = tpu.assume_multiple %449, 2 : i32
    %451 = arith.index_cast %450 : i32 to index
    %c0_122 = arith.constant 0 : index
    %452 = vector.load %arg11[%451, %c0_122] : memref<16x128xf32, #tpu.memory_space<vmem>>, vector<2x128xf32>
    %cst_123 = arith.constant dense<0.000000e+00> : vector<2x128xf32>
    %453 = tpu.matmul %446, %275, %cst_123 {dimension_numbers = #tpu.dot_dimension_numbers<[1], [0], [0], [1], [0, 0, 1, 1], [], []>} : vector<2x32xf32>, vector<32x128xf32>, vector<2x128xf32> -> vector<2x128xf32>
    %454 = arith.addf %452, %453 : vector<2x128xf32>
    %455 = vector.extract_strided_slice %454 {offsets = [0, 0], sizes = [2, 32], strides = [1, 1]} : vector<2x128xf32> to vector<2x32xf32>
    %456 = arith.negf %455 : vector<2x32xf32>
    %457 = math.exp %456 : vector<2x32xf32>
    %cst_124 = arith.constant 1.000000e+00 : f32
    %458 = vector.broadcast %cst_124 : f32 to vector<2x32xf32>
    %459 = arith.addf %458, %457 : vector<2x32xf32>
    %460 = arith.divf %458, %459 : vector<2x32xf32>
    %461 = vector.extract_strided_slice %454 {offsets = [0, 32], sizes = [2, 32], strides = [1, 1]} : vector<2x128xf32> to vector<2x32xf32>
    %462 = arith.negf %461 : vector<2x32xf32>
    %463 = math.exp %462 : vector<2x32xf32>
    %cst_125 = arith.constant 1.000000e+00 : f32
    %464 = vector.broadcast %cst_125 : f32 to vector<2x32xf32>
    %465 = arith.addf %464, %463 : vector<2x32xf32>
    %466 = arith.divf %464, %465 : vector<2x32xf32>
    %467 = vector.extract_strided_slice %454 {offsets = [0, 64], sizes = [2, 32], strides = [1, 1]} : vector<2x128xf32> to vector<2x32xf32>
    %468 = math.tanh %467 : vector<2x32xf32>
    %469 = vector.extract_strided_slice %454 {offsets = [0, 96], sizes = [2, 32], strides = [1, 1]} : vector<2x128xf32> to vector<2x32xf32>
    %470 = arith.negf %469 : vector<2x32xf32>
    %471 = math.exp %470 : vector<2x32xf32>
    %cst_126 = arith.constant 1.000000e+00 : f32
    %472 = vector.broadcast %cst_126 : f32 to vector<2x32xf32>
    %473 = arith.addf %472, %471 : vector<2x32xf32>
    %474 = arith.divf %472, %473 : vector<2x32xf32>
    %475 = arith.mulf %466, %444 : vector<2x32xf32>
    %476 = arith.mulf %460, %468 : vector<2x32xf32>
    %477 = arith.addf %475, %476 : vector<2x32xf32>
    %478 = math.tanh %477 : vector<2x32xf32>
    %479 = arith.mulf %474, %478 : vector<2x32xf32>
    %480 = arith.index_cast %450 : i32 to index
    %c0_127 = arith.constant 0 : index
    %481 = vector.load %arg10[%480, %c0_127] : memref<16x32xf32, #tpu.memory_space<vmem>>, vector<2x32xf32>
    tpu.vector_store %arg10[%480, %c0_127], %479 {strides = array<i32>} : memref<16x32xf32, #tpu.memory_space<vmem>>, vector<2x32xf32>,
    %c6_i32_128 = arith.constant 6 : i32
    %c2_i32_129 = arith.constant 2 : i32
    %482 = arith.muli %c6_i32_128, %c2_i32_129 : i32
    %483 = tpu.assume_multiple %482, 2 : i32
    %484 = arith.index_cast %483 : i32 to index
    %c0_130 = arith.constant 0 : index
    %485 = vector.load %arg11[%484, %c0_130] : memref<16x128xf32, #tpu.memory_space<vmem>>, vector<2x128xf32>
    %cst_131 = arith.constant dense<0.000000e+00> : vector<2x128xf32>
    %486 = tpu.matmul %479, %275, %cst_131 {dimension_numbers = #tpu.dot_dimension_numbers<[1], [0], [0], [1], [0, 0, 1, 1], [], []>} : vector<2x32xf32>, vector<32x128xf32>, vector<2x128xf32> -> vector<2x128xf32>
    %487 = arith.addf %485, %486 : vector<2x128xf32>
    %488 = vector.extract_strided_slice %487 {offsets = [0, 0], sizes = [2, 32], strides = [1, 1]} : vector<2x128xf32> to vector<2x32xf32>
    %489 = arith.negf %488 : vector<2x32xf32>
    %490 = math.exp %489 : vector<2x32xf32>
    %cst_132 = arith.constant 1.000000e+00 : f32
    %491 = vector.broadcast %cst_132 : f32 to vector<2x32xf32>
    %492 = arith.addf %491, %490 : vector<2x32xf32>
    %493 = arith.divf %491, %492 : vector<2x32xf32>
    %494 = vector.extract_strided_slice %487 {offsets = [0, 32], sizes = [2, 32], strides = [1, 1]} : vector<2x128xf32> to vector<2x32xf32>
    %495 = arith.negf %494 : vector<2x32xf32>
    %496 = math.exp %495 : vector<2x32xf32>
    %cst_133 = arith.constant 1.000000e+00 : f32
    %497 = vector.broadcast %cst_133 : f32 to vector<2x32xf32>
    %498 = arith.addf %497, %496 : vector<2x32xf32>
    %499 = arith.divf %497, %498 : vector<2x32xf32>
    %500 = vector.extract_strided_slice %487 {offsets = [0, 64], sizes = [2, 32], strides = [1, 1]} : vector<2x128xf32> to vector<2x32xf32>
    %501 = math.tanh %500 : vector<2x32xf32>
    %502 = vector.extract_strided_slice %487 {offsets = [0, 96], sizes = [2, 32], strides = [1, 1]} : vector<2x128xf32> to vector<2x32xf32>
    %503 = arith.negf %502 : vector<2x32xf32>
    %504 = math.exp %503 : vector<2x32xf32>
    %cst_134 = arith.constant 1.000000e+00 : f32
    %505 = vector.broadcast %cst_134 : f32 to vector<2x32xf32>
    %506 = arith.addf %505, %504 : vector<2x32xf32>
    %507 = arith.divf %505, %506 : vector<2x32xf32>
    %508 = arith.mulf %499, %477 : vector<2x32xf32>
    %509 = arith.mulf %493, %501 : vector<2x32xf32>
    %510 = arith.addf %508, %509 : vector<2x32xf32>
    %511 = math.tanh %510 : vector<2x32xf32>
    %512 = arith.mulf %507, %511 : vector<2x32xf32>
    %513 = arith.index_cast %483 : i32 to index
    %c0_135 = arith.constant 0 : index
    %514 = vector.load %arg10[%513, %c0_135] : memref<16x32xf32, #tpu.memory_space<vmem>>, vector<2x32xf32>
    tpu.vector_store %arg10[%513, %c0_135], %512 {strides = array<i32>} : memref<16x32xf32, #tpu.memory_space<vmem>>, vector<2x32xf32>,
    %c7_i32_136 = arith.constant 7 : i32
    %c2_i32_137 = arith.constant 2 : i32
    %515 = arith.muli %c7_i32_136, %c2_i32_137 : i32
    %516 = tpu.assume_multiple %515, 2 : i32
    %517 = arith.index_cast %516 : i32 to index
    %c0_138 = arith.constant 0 : index
    %518 = vector.load %arg11[%517, %c0_138] : memref<16x128xf32, #tpu.memory_space<vmem>>, vector<2x128xf32>
    %cst_139 = arith.constant dense<0.000000e+00> : vector<2x128xf32>
    %519 = tpu.matmul %512, %275, %cst_139 {dimension_numbers = #tpu.dot_dimension_numbers<[1], [0], [0], [1], [0, 0, 1, 1], [], []>} : vector<2x32xf32>, vector<32x128xf32>, vector<2x128xf32> -> vector<2x128xf32>
    %520 = arith.addf %518, %519 : vector<2x128xf32>
    %521 = vector.extract_strided_slice %520 {offsets = [0, 0], sizes = [2, 32], strides = [1, 1]} : vector<2x128xf32> to vector<2x32xf32>
    %522 = arith.negf %521 : vector<2x32xf32>
    %523 = math.exp %522 : vector<2x32xf32>
    %cst_140 = arith.constant 1.000000e+00 : f32
    %524 = vector.broadcast %cst_140 : f32 to vector<2x32xf32>
    %525 = arith.addf %524, %523 : vector<2x32xf32>
    %526 = arith.divf %524, %525 : vector<2x32xf32>
    %527 = vector.extract_strided_slice %520 {offsets = [0, 32], sizes = [2, 32], strides = [1, 1]} : vector<2x128xf32> to vector<2x32xf32>
    %528 = arith.negf %527 : vector<2x32xf32>
    %529 = math.exp %528 : vector<2x32xf32>
    %cst_141 = arith.constant 1.000000e+00 : f32
    %530 = vector.broadcast %cst_141 : f32 to vector<2x32xf32>
    %531 = arith.addf %530, %529 : vector<2x32xf32>
    %532 = arith.divf %530, %531 : vector<2x32xf32>
    %533 = vector.extract_strided_slice %520 {offsets = [0, 64], sizes = [2, 32], strides = [1, 1]} : vector<2x128xf32> to vector<2x32xf32>
    %534 = math.tanh %533 : vector<2x32xf32>
    %535 = vector.extract_strided_slice %520 {offsets = [0, 96], sizes = [2, 32], strides = [1, 1]} : vector<2x128xf32> to vector<2x32xf32>
    %536 = arith.negf %535 : vector<2x32xf32>
    %537 = math.exp %536 : vector<2x32xf32>
    %cst_142 = arith.constant 1.000000e+00 : f32
    %538 = vector.broadcast %cst_142 : f32 to vector<2x32xf32>
    %539 = arith.addf %538, %537 : vector<2x32xf32>
    %540 = arith.divf %538, %539 : vector<2x32xf32>
    %541 = arith.mulf %532, %510 : vector<2x32xf32>
    %542 = arith.mulf %526, %534 : vector<2x32xf32>
    %543 = arith.addf %541, %542 : vector<2x32xf32>
    %544 = math.tanh %543 : vector<2x32xf32>
    %545 = arith.mulf %540, %544 : vector<2x32xf32>
    %546 = arith.index_cast %516 : i32 to index
    %c0_143 = arith.constant 0 : index
    %547 = vector.load %arg10[%546, %c0_143] : memref<16x32xf32, #tpu.memory_space<vmem>>, vector<2x32xf32>
    tpu.vector_store %arg10[%546, %c0_143], %545 {strides = array<i32>} : memref<16x32xf32, #tpu.memory_space<vmem>>, vector<2x32xf32>,
    %c8_i32_144 = arith.constant 8 : i32
    %c0_145 = arith.constant 0 : index
    %c0_146 = arith.constant 0 : index
    %548 = vector.load %arg7[%c0_145, %c0_146] : memref<32x1xf32, #tpu.memory_space<vmem>>, vector<32x1xf32>
    %cst_147 = arith.constant dense<0.000000e+00> : vector<2x1xf32>
    %549 = tpu.matmul %545, %548, %cst_147 {dimension_numbers = #tpu.dot_dimension_numbers<[1], [0], [0], [1], [0, 0, 1, 1], [], []>} : vector<2x32xf32>, vector<32x1xf32>, vector<2x1xf32> -> vector<2x1xf32>
    %c0_148 = arith.constant 0 : index
    %c0_149 = arith.constant 0 : index
    %550 = vector.load %arg8[%c0_148, %c0_149] : memref<1x1xf32, #tpu.memory_space<vmem>>, vector<1x1xf32>
    %551 = vector.broadcast %550 : vector<1x1xf32> to vector<2x1xf32>
    %552 = arith.addf %549, %551 : vector<2x1xf32>
    %553 = arith.negf %552 : vector<2x1xf32>
    %554 = math.exp %553 : vector<2x1xf32>
    %cst_150 = arith.constant 1.000000e+00 : f32
    %555 = vector.broadcast %cst_150 : f32 to vector<2x1xf32>
    %556 = arith.addf %555, %554 : vector<2x1xf32>
    %557 = arith.divf %555, %556 : vector<2x1xf32>
    %c0_151 = arith.constant 0 : index
    %c0_152 = arith.constant 0 : index
    %558 = vector.load %arg9[%c0_151, %c0_152] : memref<2x1xf32, #tpu.memory_space<vmem>>, vector<2x1xf32>
    tpu.vector_store %arg9[%c0_151, %c0_152], %557 {strides = array<i32>} : memref<2x1xf32, #tpu.memory_space<vmem>>, vector<2x1xf32>,
    return
  }
}

</mosaic_0001>

<bundles_post_ra>
// kernel: tpu_custom_call.1
= control target key start
LH: loop header
LB: loop body
LE: loop exit
PB: predicated region body
PF: predicated region fallthrough
CT: control target
= control target key end

     0   :  { %s3019_s0 = inlined_call_operand.hbm [shape: f32[16,16], index: 0, kind: input, shape index: {}]   ;;  %s3020_s1 = inlined_call_operand.hbm [shape: f32[16,128], index: 1, kind: input, shape index: {}]   ;;  %s3021_s2 = inlined_call_operand.vmem [shape: f32[32,128], index: 2, kind: input, shape index: {}]   ;;  %s3022_s3 = inlined_call_operand.vmem [shape: f32[1,128], index: 3, kind: input, shape index: {}]   ;;  %s3023_s4 = inlined_call_operand.hbm [shape: f32[32,128], index: 4, kind: input, shape index: {}]   ;;  %s3024_s5 = inlined_call_operand.hbm [shape: f32[32,128], index: 5, kind: input, shape index: {}]   ;;  %s3025_s6 = inlined_call_operand.vmem [shape: f32[1,128], index: 6, kind: input, shape index: {}]   ;;  %s3026_s7 = inlined_call_operand.vmem [shape: f32[32,1], index: 7, kind: input, shape index: {}]   ;;  %s3027_s8 = inlined_call_operand.<no memory space> [shape: f32[1,1], index: 8, kind: input, shape index: {}]   ;;  %s3028_s9 = inlined_call_operand.vmem [shape: f32[2,1], index: 9, kind: output, shape index: {}]  }
   0x1   :  { %v14_v0 = vstv %s3027_s8 }
   0x2   :  { %15 = vst [vmem:[#allocation4] sm:$0x1] %v14_v0 }
   0x3   :  { %16 = vsyncpa [#allocation6], 0 }
   0x4   :  { %17 = vsyncpa [#allocation8], 0 }
   0x5   :  { %18 = vsyncpa [#allocation11], 0  ;;  %s2616_s11 = smov [#allocation7]   ;;  %s2617_s13 = smov [#allocation5]  }
   0x6   :  { %s36_s12 = sshll.u32 %s2616_s11, 4  ;;  %s24_s14 = sshll.u32 %s2617_s13, 4  ;;  %s37_s12 = int_to_ptr.vmem [resolvable:$true] %s36_s12  ;;  %s25_s14 = int_to_ptr.vmem [resolvable:$true] %s24_s14 }
   0x7   :  { %s2538_s15 = scalar_lea.vmem %s37_s12, 256  ;;  %p2543_p1 = scmp.lt.s32.totalorder %s37_s12, %s37_s12 }
   0x8   :  { %p2539_p0 = scmp.ne.s32.totalorder %s37_s12, %s2538_s15  ;;  %p2544_p2 = scmp.lt.s32.totalorder %s2538_s15, %s2538_s15 }
   0xa   :  { %p2545_p3 = por %p2544_p2, %p2543_p1 }
   0xc   :  { %p2546_p4 = pnand %p2545_p3, %p2539_p0 }
   0xe   :  { %2549 = shalt.err (!%p2546_p4)
}
   0xf   :  { %s2618_s16 = smov 128   ;;  %s2619_s17 = smov 8  }
  0x10   :  { %42 = dma.hbm_to_vmem [thread:$0]  %s3020_s1, 256, %s37_s12, [#allocation8], %s2618_s16, %s2618_s16, %s2619_s17  }
  0x11   :  { %s2558_s19 = scalar_lea.vmem %s25_s14, 256  ;;  %p2563_p6 = scmp.lt.s32.totalorder %s25_s14, %s25_s14 }
  0x12   :  { %p2559_p5 = scmp.ne.s32.totalorder %s25_s14, %s2558_s19  ;;  %p2564_p7 = scmp.lt.s32.totalorder %s2558_s19, %s2558_s19 }
  0x14   :  { %p2565_p8 = por %p2564_p7, %p2563_p6 }
  0x16   :  { %p2566_p9 = pnand %p2565_p8, %p2559_p5 }
  0x18   :  { %2569 = shalt.err (!%p2566_p9)
}
  0x19   :  { %30 = dma.hbm_to_vmem [thread:$0]  %s3019_s0, 256, %s25_s14, [#allocation6], %s2618_s16, %s2618_s16, %s2619_s17  }
  0x1a   :  { %s2620_s22 = smov [#allocation9]   ;;  %s2621_s24 = smov [#allocation10]  }
  0x1b   :  { %s52_s23 = sshll.u32 %s2620_s22, 4  ;;  %s64_s25 = sshll.u32 %s2621_s24, 4  ;;  %s53_s23 = int_to_ptr.vmem [resolvable:$true] %s52_s23  ;;  %s65_s25 = int_to_ptr.vmem [resolvable:$true] %s64_s25 }
  0x1c   :  { %s2578_s1 = scalar_lea.vmem %s53_s23, 512  ;;  %p2583_p11 = scmp.lt.s32.totalorder %s53_s23, %s53_s23 }
  0x1d   :  { %p2579_p10 = scmp.ne.s32.totalorder %s53_s23, %s2578_s1  ;;  %p2584_p12 = scmp.lt.s32.totalorder %s2578_s1, %s2578_s1 }
  0x1f   :  { %p2585_p13 = por %p2584_p12, %p2583_p11 }
  0x21   :  { %p2586_p0 = pnand %p2585_p13, %p2579_p10 }
  0x23   :  { %2589 = shalt.err (!%p2586_p0)
}
  0x24   :  { %58 = dma.hbm_to_vmem [thread:$0]  %s3023_s4, 512, %s53_s23, [#allocation8], %s2618_s16, %s2618_s16, %s2619_s17  }
  0x25   :  { %s2598_s0 = scalar_lea.vmem %s65_s25, 512  ;;  %p2603_p2 = scmp.lt.s32.totalorder %s65_s25, %s65_s25 }
  0x26   :  { %p2599_p1 = scmp.ne.s32.totalorder %s65_s25, %s2598_s0  ;;  %p2604_p3 = scmp.lt.s32.totalorder %s2598_s0, %s2598_s0 }
  0x28   :  { %p2605_p4 = por %p2604_p3, %p2603_p2 }
  0x2a   :  { %p2606_p5 = pnand %p2605_p4, %p2599_p1 }
  0x2c   :  { %2609 = shalt.err (!%p2606_p5)
}
  0x2d   :  { %70 = dma.hbm_to_vmem [thread:$0]  %s3024_s5, 512, %s65_s25, [#allocation11], %s2618_s16, %s2618_s16, %s2619_s17  }
  0x2e   :  { %2610 = dma.done.wait [#allocation6], 256  }
  0x2f   :  { %2611 = vsyncadd [#allocation6], 4294967040 }
  0x30   :  { %2612 = dma.done.wait [#allocation8], 768  }
  0x31   :  { %2613 = vsyncadd [#allocation8], 4294966528 }
  0x32   :  { %2614 = dma.done.wait [#allocation11], 512  }
  0x33   :  { %2615 = vsyncadd [#allocation11], 4294966784  ;;  %v2622_v1 = vmov 0.0   ;;  %vm2623_vm0 = vmmov 0   ;;  %vm104_vm1 = vcmask 130048   ;;  %v90_v2 = vld [vmem:[#allocation7 + $0x8] sm:$0xff] }
  0x34   :  { %2190 = vmatprep.subr.mxu1 %v2622_v1  ;;  %2198 = vmatprep.mubr.msk.f32.mxu1 %vm2623_vm0, %v2622_v1  ;;  %v89_v3 = vld [vmem:[#allocation7] sm:$0xff]  ;;  %v96_v4 = vld [vmem:[#allocation5] sm:$0xff]  ;;  %v97_v7 = vld [vmem:[#allocation5 + $0x8] sm:$0xff]  ;;  %s2624_s16 = smov 64   ;;  %vm292_vm2 = vcmask 254976   ;;  %vm189_vm3 = vcmask 261120  }
  0x35   :  { %2183 = vmatprep.subr.mxu0 %v90_v2  ;;  %2187 = vmatprep.mubr.msk.f32.mxu0 %vm104_vm1, %v96_v4  ;;  %v2710_v5 = vld [vmem:[%s3021_s2 + $0x18] sm:$0xff]  ;;  %v2715_v6 = vld [vmem:[%s3021_s2 + $0x10] sm:$0xff]  ;;  %v2722_v8 = vld [vmem:[%s3021_s2 + $0x8] sm:$0xff]  ;;  %vm2040_vm4 = vcmask 1024  }
  0x36   :  { %2184 = vmatpush3.msra.mxu0 %v90_v2  ;;  %2191 = vmatpush3.msra.mxu1 %v2710_v5  ;;  %v2730_v9 = vld [vmem:[%s3021_s2] sm:$0xff] }
  0x37   :  { %2185 = vmatprep.subr.mxu0 %v89_v3  ;;  %2192 = vmatprep.subr.mxu1 %v2622_v1  ;;  %v2049_v10 = vld [vmem:[%s3022_s3] ss:$0 sm:$0xff]  ;;  %s2625_s3 = smov 32  }
  0x38   :  { %2186 = vmatpush3.msra.mxu0 %v89_v3  ;;  %2193 = vmatpush3.msra.mxu1 %v2715_v6 }
  0x39   :  { %2188 = vmatmul.mubr.msk.f32.vlgmr.msra.gmra.mxu0 %vm104_vm1, %v97_v7  ;;  %2194 = vmatprep.subr.mxu1 %v2622_v1 }
  0x3a   :  { %2195 = vmatpush3.msra.mxu1 %v2722_v8  ;;  %2201 = vmatprep.subr.mxu0 %v2622_v1 }
  0x3b   :  { %2196 = vmatprep.subr.mxu1 %v2622_v1  ;;  %2202 = vmatpush3.msra.mxu0 %v2710_v5 }
  0x3c   :  { %2197 = vmatpush3.msra.mxu1 %v2730_v9  ;;  %2203 = vmatprep.subr.mxu0 %v2622_v1 }
  0x3d   :  { %2199 = vmatmul.mubr.f32.vlgmr.msra.gmra.mxu1 %v2622_v1  ;;  %2204 = vmatpush3.msra.mxu0 %v2715_v6 }
  0x3e   :  { %2205 = vmatprep.subr.mxu0 %v2622_v1  ;;  %2209 = vmatprep.mubr.msk.f32.mxu0 %vm2623_vm0, %v2622_v1 }
  0x3f   :  { %2206 = vmatpush3.msra.mxu0 %v2722_v8  ;;  %2212 = vmatprep.subr.mxu1 %v2622_v1 }
  0x40   :  { %2207 = vmatprep.subr.mxu0 %v2622_v1  ;;  %2213 = vmatpush3.msra.mxu1 %v2710_v5 }
  0x41   :  { %2208 = vmatpush3.msra.mxu0 %v2730_v9  ;;  %2214 = vmatprep.subr.mxu1 %v2622_v1 }
  0x42   :  { %2215 = vmatpush3.msra.mxu1 %v2715_v6  ;;  %2220 = vmatprep.mubr.msk.f32.mxu1 %vm2623_vm0, %v2622_v1 }
  0x43   :  { %2216 = vmatprep.subr.mxu1 %v2622_v1  ;;  %2223 = vmatprep.subr.mxu0 %v2622_v1 }
  0x44   :  { %2217 = vmatpush3.msra.mxu1 %v2722_v8 }
  0x45   :  { %2218 = vmatprep.subr.mxu1 %v2622_v1 }
  0x46   :  { %2219 = vmatpush3.msra.mxu1 %v2730_v9 }
  0x47   :  { %2234 = vmatprep.subr.mxu1 %v2622_v1 }
  0xf9   :  { %v2189_v11 = vpop.f32.mrf.mxu0 }
  0xfa   :  { %v183_v12 = vadd.f32 %v2189_v11, %v2049_v10 }
  0xfb   :  { %v177_v13 = vpop.f32.mrf.mxu0 }
  0xfc   :  { %187 = vst [vmem:[#allocation3 + $0x8] sm:$0xff] %v183_v12  ;;  %v178_v14 = vadd.f32 %v2049_v10, %v177_v13 }
  0xfd   :  { %v259_v15 = vpop.f32.mrf.mxu1 }
  0xfe   :  { %186 = vst [vmem:[#allocation3] sm:$0xff] %v178_v14 }
  0xff   :  { %v2200_v16 = vpop.f32.mrf.mxu1 }
 0x105   :  { %v188_v17 = vld [vmem:[#allocation3] sm:$0x3]  ;;  %v295_v33 = vld [vmem:[#allocation3 + $0x2] sm:$0x3]  ;;  %v400_v51 = vld [vmem:[#allocation3 + $0x4] sm:$0x3] }
 0x106   :  { %v263_v18 = vadd.f32 %v259_v15, %v188_v17  ;;  %v505_v10 = vld [vmem:[#allocation3 + $0x6] sm:$0x3] }
 0x108   :  { %2398 = vtanh.f32 %v263_v18  ;;  %v2052_v20 = vmul.f32 -1.442695, %v263_v18 }
 0x10a   :  { %2400 = vpow2.f32 %v2052_v20 }
 0x115   :  { %v2399_v19 = vpop.eup %2398 }
 0x116   :  { %273 = vrot.lane.b32.xlu0 %v2399_v19, %s2624_s16 }
 0x117   :  { %v2401_v21 = vpop.eup %2400 }
 0x118   :  { %v267_v22 = vadd.f32 1.0, %v2401_v21 }
 0x11a   :  { %2402 = vrcp.f32 %v267_v22 }
 0x127   :  { %v2403_v23 = vpop.eup %2402 }
 0x128   :  { %v271_v26 = vmul.f32 0.0, %v2403_v23 }
 0x188   :  { %v274_v24 = vpop.permute.xlu0 %273 }
 0x189   :  { %v276_v25 = vmul.f32 %v2403_v23, %v274_v24 }
 0x18b   :  { %278 = vrot.lane.b32.xlu0 %v276_v25, %s2625_s3 }
 0x1fd   :  { %v279_v27 = vpop.permute.xlu0 %278 }
 0x1fe   :  { %v281_v28 = vadd.f32 %v279_v27, %v271_v26 }
 0x200   :  { %2404 = vtanh.f32 %v281_v28 }
 0x20d   :  { %v2405_v29 = vpop.eup %2404 }
 0x20e   :  { %284 = vrot.lane.b32.xlu1 %v2405_v29, %s2624_s16 }
 0x280   :  { %v285_v30 = vpop.permute.xlu1 %284 }
 0x281   :  { %v287_v31 = vmul.f32 %v2403_v23, %v285_v30 }
 0x283   :  { %289 = vrot.lane.b32.xlu1 %v287_v31, %s2625_s3 }
 0x2f5   :  { %v290_v32 = vpop.permute.xlu1 %289 }
 0x2f6   :  { %293 = vst.msk [vmem:[#allocation2] sm:$0x3] %vm292_vm2, %v290_v32  ;;  %2210 = vmatmul.mubr.msk.f32.vlgmr.msra.gmra.mxu0 %vm189_vm3, %v290_v32 }
 0x2f7   :  { %2224 = vmatpush3.msra.mxu0 %v2710_v5  ;;  %2231 = vmatprep.mubr.msk.f32.mxu0 %vm2623_vm0, %v2622_v1 }
 0x2f8   :  { %2225 = vmatprep.subr.mxu0 %v2622_v1 }
 0x2f9   :  { %2226 = vmatpush3.msra.mxu0 %v2715_v6 }
 0x2fa   :  { %2227 = vmatprep.subr.mxu0 %v2622_v1 }
 0x2fb   :  { %2228 = vmatpush3.msra.mxu0 %v2722_v8 }
 0x2fc   :  { %2229 = vmatprep.subr.mxu0 %v2622_v1 }
 0x2fd   :  { %2230 = vmatpush3.msra.mxu0 %v2730_v9 }
 0x2fe   :  { %2245 = vmatprep.subr.mxu0 %v2622_v1 }
 0x3b6   :  { %v364_v34 = vpop.f32.mrf.mxu0 }
 0x3b7   :  { %v368_v35 = vadd.f32 %v364_v34, %v295_v33 }
 0x3b8   :  { %v2211_v36 = vpop.f32.mrf.mxu0 }
 0x3b9   :  { %2406 = vtanh.f32 %v368_v35  ;;  %v2054_v38 = vmul.f32 -1.442695, %v368_v35 }
 0x3bb   :  { %2408 = vpow2.f32 %v2054_v38 }
 0x3c6   :  { %v2407_v37 = vpop.eup %2406 }
 0x3c7   :  { %378 = vrot.lane.b32.xlu0 %v2407_v37, %s2624_s16 }
 0x3c8   :  { %v2409_v39 = vpop.eup %2408 }
 0x3c9   :  { %v372_v40 = vadd.f32 1.0, %v2409_v39 }
 0x3cb   :  { %2410 = vrcp.f32 %v372_v40 }
 0x3d8   :  { %v2411_v41 = vpop.eup %2410 }
 0x3d9   :  { %v376_v44 = vmul.f32 %v2411_v41, %v281_v28  ;;  %v610_v28 = vld [vmem:[#allocation3 + $0x8] sm:$0x3] }
 0x439   :  { %v379_v42 = vpop.permute.xlu0 %378 }
 0x43a   :  { %v381_v43 = vmul.f32 %v2411_v41, %v379_v42 }
 0x43c   :  { %383 = vrot.lane.b32.xlu1 %v381_v43, %s2625_s3 }
 0x4ae   :  { %v384_v45 = vpop.permute.xlu1 %383 }
 0x4af   :  { %v386_v46 = vadd.f32 %v384_v45, %v376_v44 }
 0x4b1   :  { %2412 = vtanh.f32 %v386_v46 }
 0x4be   :  { %v2413_v47 = vpop.eup %2412 }
 0x4bf   :  { %389 = vrot.lane.b32.xlu0 %v2413_v47, %s2624_s16 }
 0x531   :  { %v390_v48 = vpop.permute.xlu0 %389 }
 0x532   :  { %v392_v49 = vmul.f32 %v2411_v41, %v390_v48 }
 0x534   :  { %394 = vrot.lane.b32.xlu1 %v392_v49, %s2625_s3 }
 0x5a6   :  { %v395_v50 = vpop.permute.xlu1 %394 }
 0x5a7   :  { %398 = vst.msk [vmem:[#allocation2 + $0x2] sm:$0x3] %vm292_vm2, %v395_v50  ;;  %2221 = vmatmul.mubr.msk.f32.vlgmr.msra.gmra.mxu1 %vm189_vm3, %v395_v50 }
 0x5a8   :  { %2235 = vmatpush3.msra.mxu1 %v2710_v5  ;;  %2242 = vmatprep.mubr.msk.f32.mxu1 %vm2623_vm0, %v2622_v1 }
 0x5a9   :  { %2236 = vmatprep.subr.mxu1 %v2622_v1 }
 0x5aa   :  { %2237 = vmatpush3.msra.mxu1 %v2715_v6 }
 0x5ab   :  { %2238 = vmatprep.subr.mxu1 %v2622_v1 }
 0x5ac   :  { %2239 = vmatpush3.msra.mxu1 %v2722_v8 }
 0x5ad   :  { %2240 = vmatprep.subr.mxu1 %v2622_v1 }
 0x5ae   :  { %2241 = vmatpush3.msra.mxu1 %v2730_v9 }
 0x5af   :  { %2256 = vmatprep.subr.mxu1 %v2622_v1 }
 0x667   :  { %v469_v52 = vpop.f32.mrf.mxu1 }
 0x668   :  { %v473_v53 = vadd.f32 %v469_v52, %v400_v51 }
 0x669   :  { %v2222_v54 = vpop.f32.mrf.mxu1 }
 0x66a   :  { %2414 = vtanh.f32 %v473_v53  ;;  %v2056_v56 = vmul.f32 -1.442695, %v473_v53 }
 0x66c   :  { %2416 = vpow2.f32 %v2056_v56 }
 0x677   :  { %v2415_v55 = vpop.eup %2414 }
 0x678   :  { %483 = vrot.lane.b32.xlu0 %v2415_v55, %s2624_s16 }
 0x679   :  { %v2417_v57 = vpop.eup %2416 }
 0x67a   :  { %v477_v58 = vadd.f32 1.0, %v2417_v57 }
 0x67c   :  { %2418 = vrcp.f32 %v477_v58 }
 0x689   :  { %v2419_v59 = vpop.eup %2418 }
 0x68a   :  { %v481_v62 = vmul.f32 %v2419_v59, %v386_v46  ;;  %v715_v46 = vld [vmem:[#allocation3 + $0xa] sm:$0x3] }
 0x6ea   :  { %v484_v60 = vpop.permute.xlu0 %483 }
 0x6eb   :  { %v486_v61 = vmul.f32 %v2419_v59, %v484_v60 }
 0x6ed   :  { %488 = vrot.lane.b32.xlu1 %v486_v61, %s2625_s3  ;;  %v820_v61 = vld [vmem:[#allocation3 + $0xc] sm:$0x3] }
 0x75f   :  { %v489_v63 = vpop.permute.xlu1 %488 }
 0x760   :  { %v491_v0 = vadd.f32 %v489_v63, %v481_v62 }
 0x762   :  { %2420 = vtanh.f32 %v491_v0 }
 0x76f   :  { %v2421_v2 = vpop.eup %2420 }
 0x770   :  { %494 = vrot.lane.b32.xlu0 %v2421_v2, %s2624_s16 }
 0x7e2   :  { %v495_v3 = vpop.permute.xlu0 %494 }
 0x7e3   :  { %v497_v4 = vmul.f32 %v2419_v59, %v495_v3 }
 0x7e5   :  { %499 = vrot.lane.b32.xlu1 %v497_v4, %s2625_s3 }
 0x857   :  { %v500_v7 = vpop.permute.xlu1 %499 }
 0x858   :  { %503 = vst.msk [vmem:[#allocation2 + $0x4] sm:$0x3] %vm292_vm2, %v500_v7  ;;  %2232 = vmatmul.mubr.msk.f32.vlgmr.msra.gmra.mxu0 %vm189_vm3, %v500_v7 }
 0x859   :  { %2246 = vmatpush3.msra.mxu0 %v2710_v5  ;;  %2253 = vmatprep.mubr.msk.f32.mxu0 %vm2623_vm0, %v2622_v1 }
 0x85a   :  { %2247 = vmatprep.subr.mxu0 %v2622_v1 }
 0x85b   :  { %2248 = vmatpush3.msra.mxu0 %v2715_v6 }
 0x85c   :  { %2249 = vmatprep.subr.mxu0 %v2622_v1 }
 0x85d   :  { %2250 = vmatpush3.msra.mxu0 %v2722_v8 }
 0x85e   :  { %2251 = vmatprep.subr.mxu0 %v2622_v1 }
 0x85f   :  { %2252 = vmatpush3.msra.mxu0 %v2730_v9 }
 0x860   :  { %2267 = vmatprep.subr.mxu0 %v2622_v1 }
 0x918   :  { %v574_v11 = vpop.f32.mrf.mxu0 }
 0x919   :  { %v578_v12 = vadd.f32 %v574_v11, %v505_v10 }
 0x91a   :  { %v2233_v13 = vpop.f32.mrf.mxu0 }
 0x91b   :  { %2422 = vtanh.f32 %v578_v12  ;;  %v2058_v15 = vmul.f32 -1.442695, %v578_v12 }
 0x91d   :  { %2424 = vpow2.f32 %v2058_v15 }
 0x928   :  { %v2423_v14 = vpop.eup %2422 }
 0x929   :  { %588 = vrot.lane.b32.xlu0 %v2423_v14, %s2624_s16 }
 0x92a   :  { %v2425_v16 = vpop.eup %2424 }
 0x92b   :  { %v582_v17 = vadd.f32 1.0, %v2425_v16 }
 0x92d   :  { %2426 = vrcp.f32 %v582_v17 }
 0x93a   :  { %v2427_v18 = vpop.eup %2426 }
 0x93b   :  { %v586_v21 = vmul.f32 %v2427_v18, %v491_v0 }
 0x99b   :  { %v589_v19 = vpop.permute.xlu0 %588 }
 0x99c   :  { %v591_v20 = vmul.f32 %v2427_v18, %v589_v19 }
 0x99e   :  { %593 = vrot.lane.b32.xlu1 %v591_v20, %s2625_s3  ;;  %v925_v20 = vld [vmem:[#allocation3 + $0xe] sm:$0x3] }
 0xa10   :  { %v594_v22 = vpop.permute.xlu1 %593 }
 0xa11   :  { %v596_v23 = vadd.f32 %v594_v22, %v586_v21 }
 0xa13   :  { %2428 = vtanh.f32 %v596_v23 }
 0xa20   :  { %v2429_v24 = vpop.eup %2428 }
 0xa21   :  { %599 = vrot.lane.b32.xlu0 %v2429_v24, %s2624_s16 }
 0xa93   :  { %v600_v25 = vpop.permute.xlu0 %599 }
 0xa94   :  { %v602_v26 = vmul.f32 %v2427_v18, %v600_v25 }
 0xa96   :  { %604 = vrot.lane.b32.xlu1 %v602_v26, %s2625_s3 }
 0xb08   :  { %v605_v27 = vpop.permute.xlu1 %604 }
 0xb09   :  { %608 = vst.msk [vmem:[#allocation2 + $0x6] sm:$0x3] %vm292_vm2, %v605_v27  ;;  %2243 = vmatmul.mubr.msk.f32.vlgmr.msra.gmra.mxu1 %vm189_vm3, %v605_v27 }
 0xb0a   :  { %2257 = vmatpush3.msra.mxu1 %v2710_v5  ;;  %2264 = vmatprep.mubr.msk.f32.mxu1 %vm2623_vm0, %v2622_v1 }
 0xb0b   :  { %2258 = vmatprep.subr.mxu1 %v2622_v1 }
 0xb0c   :  { %2259 = vmatpush3.msra.mxu1 %v2715_v6 }
 0xb0d   :  { %2260 = vmatprep.subr.mxu1 %v2622_v1 }
 0xb0e   :  { %2261 = vmatpush3.msra.mxu1 %v2722_v8 }
 0xb0f   :  { %2262 = vmatprep.subr.mxu1 %v2622_v1 }
 0xb10   :  { %2263 = vmatpush3.msra.mxu1 %v2730_v9  ;;  %v1038_v60 = vld [vmem:[#allocation2] sm:$0xff] }
 0xbc9   :  { %v679_v29 = vpop.f32.mrf.mxu1 }
 0xbca   :  { %v683_v30 = vadd.f32 %v679_v29, %v610_v28 }
 0xbcb   :  { %v2244_v31 = vpop.f32.mrf.mxu1 }
 0xbcc   :  { %2430 = vtanh.f32 %v683_v30  ;;  %v2060_v33 = vmul.f32 -1.442695, %v683_v30 }
 0xbce   :  { %2432 = vpow2.f32 %v2060_v33 }
 0xbd9   :  { %v2431_v32 = vpop.eup %2430 }
 0xbda   :  { %693 = vrot.lane.b32.xlu0 %v2431_v32, %s2624_s16 }
 0xbdb   :  { %v2433_v34 = vpop.eup %2432 }
 0xbdc   :  { %v687_v35 = vadd.f32 1.0, %v2433_v34 }
 0xbde   :  { %2434 = vrcp.f32 %v687_v35  ;;  %v1032_v35 = vld [vmem:[#allocation9 + $0x18] sm:$0xff] }
 0xbdf   :  { %2278 = vmatprep.subr.mxu1 %v1032_v35 }
 0xbeb   :  { %v2435_v36 = vpop.eup %2434 }
 0xbec   :  { %v691_v39 = vmul.f32 %v2435_v36, %v596_v23 }
 0xc4c   :  { %v694_v37 = vpop.permute.xlu0 %693 }
 0xc4d   :  { %v696_v38 = vmul.f32 %v2435_v36, %v694_v37  ;;  %v1030_v37 = vld [vmem:[#allocation9 + $0x8] sm:$0xff] }
 0xc4f   :  { %698 = vrot.lane.b32.xlu1 %v696_v38, %s2625_s3  ;;  %v1029_v38 = vld [vmem:[#allocation9] sm:$0xff] }
 0xcc1   :  { %v699_v40 = vpop.permute.xlu1 %698 }
 0xcc2   :  { %v701_v41 = vadd.f32 %v699_v40, %v691_v39  ;;  %v2858_v39 = vld [vmem:[#allocation10 + $0x18] sm:$0xff]  ;;  %v2860_v40 = vld [vmem:[#allocation10 + $0x10] sm:$0xff] }
 0xcc4   :  { %2436 = vtanh.f32 %v701_v41 }
 0xcd1   :  { %v2437_v42 = vpop.eup %2436 }
 0xcd2   :  { %704 = vrot.lane.b32.xlu0 %v2437_v42, %s2624_s16  ;;  %v2865_v42 = vld [vmem:[#allocation10 + $0x8] sm:$0xff] }
 0xd44   :  { %v705_v43 = vpop.permute.xlu0 %704 }
 0xd45   :  { %v707_v44 = vmul.f32 %v2435_v36, %v705_v43  ;;  %v1031_v36 = vld [vmem:[#allocation9 + $0x10] sm:$0xff] }
 0xd47   :  { %709 = vrot.lane.b32.xlu1 %v707_v44, %s2625_s3  ;;  %v2869_v44 = vld [vmem:[#allocation10] sm:$0xff] }
 0xdb9   :  { %v710_v45 = vpop.permute.xlu1 %709 }
 0xdba   :  { %713 = vst.msk [vmem:[#allocation2 + $0x8] sm:$0x3] %vm292_vm2, %v710_v45  ;;  %2254 = vmatmul.mubr.msk.f32.vlgmr.msra.gmra.mxu0 %vm189_vm3, %v710_v45 }
 0xdbb   :  { %2268 = vmatpush3.msra.mxu0 %v2710_v5  ;;  %2275 = vmatprep.mubr.msk.f32.mxu0 %vm2623_vm0, %v2622_v1 }
 0xdbc   :  { %2269 = vmatprep.subr.mxu0 %v2622_v1 }
 0xdbd   :  { %2270 = vmatpush3.msra.mxu0 %v2715_v6 }
 0xdbe   :  { %2271 = vmatprep.subr.mxu0 %v2622_v1 }
 0xdbf   :  { %2272 = vmatpush3.msra.mxu0 %v2722_v8 }
 0xdc0   :  { %2273 = vmatprep.subr.mxu0 %v2622_v1 }
 0xdc1   :  { %2274 = vmatpush3.msra.mxu0 %v2730_v9 }
 0xdc2   :  { %2289 = vmatprep.subr.mxu0 %v2622_v1 }
 0xe7a   :  { %v784_v47 = vpop.f32.mrf.mxu0 }
 0xe7b   :  { %v788_v5 = vadd.f32 %v784_v47, %v715_v46 }
 0xe7c   :  { %v2255_v48 = vpop.f32.mrf.mxu0 }
 0xe7d   :  { %2438 = vtanh.f32 %v788_v5  ;;  %v2062_v50 = vmul.f32 -1.442695, %v788_v5  ;;  %v2067_v48 = vld [vmem:[%s3025_s6] ss:$0 sm:$0xff] }
 0xe7f   :  { %2440 = vpow2.f32 %v2062_v50 }
 0xe8a   :  { %v2439_v49 = vpop.eup %2438 }
 0xe8b   :  { %798 = vrot.lane.b32.xlu0 %v2439_v49, %s2624_s16 }
 0xe8c   :  { %v2441_v6 = vpop.eup %2440 }
 0xe8d   :  { %v792_v51 = vadd.f32 1.0, %v2441_v6 }
 0xe8f   :  { %2442 = vrcp.f32 %v792_v51 }
 0xe9c   :  { %v2443_v8 = vpop.eup %2442 }
 0xe9d   :  { %v796_v9 = vmul.f32 %v2443_v8, %v701_v41 }
 0xefd   :  { %v799_v52 = vpop.permute.xlu0 %798 }
 0xefe   :  { %v801_v53 = vmul.f32 %v2443_v8, %v799_v52 }
 0xf00   :  { %803 = vrot.lane.b32.xlu1 %v801_v53, %s2625_s3 }
 0xf72   :  { %v804_v54 = vpop.permute.xlu1 %803 }
 0xf73   :  { %v806_v55 = vadd.f32 %v804_v54, %v796_v9 }
 0xf75   :  { %2444 = vtanh.f32 %v806_v55 }
 0xf82   :  { %v2445_v56 = vpop.eup %2444 }
 0xf83   :  { %809 = vrot.lane.b32.xlu0 %v2445_v56, %s2624_s16 }
 0xff5   :  { %v810_v57 = vpop.permute.xlu0 %809 }
 0xff6   :  { %v812_v58 = vmul.f32 %v2443_v8, %v810_v57 }
 0xff8   :  { %814 = vrot.lane.b32.xlu1 %v812_v58, %s2625_s3 }
0x106a   :  { %v815_v59 = vpop.permute.xlu1 %814 }
0x106b   :  { %818 = vst.msk [vmem:[#allocation2 + $0xa] sm:$0x3] %vm292_vm2, %v815_v59  ;;  %2265 = vmatmul.mubr.msk.f32.vlgmr.msra.gmra.mxu1 %vm189_vm3, %v815_v59 }
0x106c   :  { %2286 = vmatprep.mubr.msk.f32.mxu1 %vm189_vm3, %v1038_v60  ;;  %2279 = vmatpush3.msra.mxu1 %v1032_v35 }
0x106d   :  { %2280 = vmatprep.subr.mxu1 %v1031_v36 }
0x106e   :  { %2281 = vmatpush3.msra.mxu1 %v1031_v36 }
0x106f   :  { %2282 = vmatprep.subr.mxu1 %v1030_v37 }
0x1070   :  { %2283 = vmatpush3.msra.mxu1 %v1030_v37 }
0x1071   :  { %2284 = vmatprep.subr.mxu1 %v1029_v38 }
0x1072   :  { %2285 = vmatpush3.msra.mxu1 %v1029_v38 }
0x1073   :  { %2300 = vmatprep.subr.mxu1 %v2622_v1 }
0x112b   :  { %v889_v62 = vpop.f32.mrf.mxu1 }
0x112c   :  { %v893_v63 = vadd.f32 %v889_v62, %v820_v61 }
0x112d   :  { %v2266_v0 = vpop.f32.mrf.mxu1 }
0x112e   :  { %2446 = vtanh.f32 %v893_v63  ;;  %v2064_v3 = vmul.f32 -1.442695, %v893_v63 }
0x1130   :  { %2448 = vpow2.f32 %v2064_v3 }
0x113b   :  { %v2447_v2 = vpop.eup %2446 }
0x113c   :  { %903 = vrot.lane.b32.xlu0 %v2447_v2, %s2624_s16 }
0x113d   :  { %v2449_v4 = vpop.eup %2448 }
0x113e   :  { %v897_v7 = vadd.f32 1.0, %v2449_v4 }
0x1140   :  { %2450 = vrcp.f32 %v897_v7 }
0x114d   :  { %v2451_v10 = vpop.eup %2450 }
0x114e   :  { %v901_v13 = vmul.f32 %v2451_v10, %v806_v55 }
0x11ae   :  { %v904_v11 = vpop.permute.xlu0 %903 }
0x11af   :  { %v906_v12 = vmul.f32 %v2451_v10, %v904_v11 }
0x11b1   :  { %908 = vrot.lane.b32.xlu1 %v906_v12, %s2625_s3 }
0x1223   :  { %v909_v14 = vpop.permute.xlu1 %908 }
0x1224   :  { %v911_v15 = vadd.f32 %v909_v14, %v901_v13 }
0x1226   :  { %2452 = vtanh.f32 %v911_v15 }
0x1233   :  { %v2453_v16 = vpop.eup %2452 }
0x1234   :  { %914 = vrot.lane.b32.xlu0 %v2453_v16, %s2624_s16 }
0x12a6   :  { %v915_v17 = vpop.permute.xlu0 %914 }
0x12a7   :  { %v917_v18 = vmul.f32 %v2451_v10, %v915_v17 }
0x12a9   :  { %919 = vrot.lane.b32.xlu1 %v917_v18, %s2625_s3 }
0x131b   :  { %v920_v19 = vpop.permute.xlu1 %919 }
0x131c   :  { %923 = vst.msk [vmem:[#allocation2 + $0xc] sm:$0x3] %vm292_vm2, %v920_v19  ;;  %2276 = vmatmul.mubr.msk.f32.vlgmr.msra.gmra.mxu0 %vm189_vm3, %v920_v19 }
0x131d   :  { %2297 = vmatprep.mubr.msk.f32.mxu0 %vm2623_vm0, %v2622_v1  ;;  %2290 = vmatpush3.msra.mxu0 %v2858_v39 }
0x131e   :  { %2291 = vmatprep.subr.mxu0 %v2622_v1 }
0x131f   :  { %2292 = vmatpush3.msra.mxu0 %v2860_v40 }
0x1320   :  { %2293 = vmatprep.subr.mxu0 %v2622_v1 }
0x1321   :  { %2294 = vmatpush3.msra.mxu0 %v2865_v42 }
0x1322   :  { %2295 = vmatprep.subr.mxu0 %v2622_v1 }
0x1323   :  { %2296 = vmatpush3.msra.mxu0 %v2869_v44 }
0x1324   :  { %2298 = vmatmul.mubr.f32.vlgmr.msra.gmra.mxu0 %v2622_v1  ;;  %2311 = vmatprep.subr.mxu0 %v2622_v1 }
0x1325   :  { %2312 = vmatpush3.msra.mxu0 %v2858_v39  ;;  %2319 = vmatprep.mubr.msk.f32.mxu0 %vm2623_vm0, %v2622_v1 }
0x1326   :  { %2313 = vmatprep.subr.mxu0 %v2622_v1 }
0x1327   :  { %2314 = vmatpush3.msra.mxu0 %v2860_v40 }
0x1328   :  { %2315 = vmatprep.subr.mxu0 %v2622_v1 }
0x1329   :  { %2316 = vmatpush3.msra.mxu0 %v2865_v42 }
0x132a   :  { %2317 = vmatprep.subr.mxu0 %v2622_v1 }
0x132b   :  { %2318 = vmatpush3.msra.mxu0 %v2869_v44 }
0x132c   :  { %2333 = vmatprep.subr.mxu0 %v2622_v1 }
0x13dc   :  { %v994_v21 = vpop.f32.mrf.mxu0 }
0x13dd   :  { %v998_v22 = vadd.f32 %v994_v21, %v925_v20 }
0x13de   :  { %v2277_v23 = vpop.f32.mrf.mxu0 }
0x13df   :  { %2454 = vtanh.f32 %v998_v22  ;;  %v2066_v25 = vmul.f32 -1.442695, %v998_v22 }
0x13e1   :  { %2456 = vpow2.f32 %v2066_v25 }
0x13e4   :  { %v1196_v47 = vpop.f32.mrf.mxu0 }
0x13e6   :  { %v2299_v5 = vpop.f32.mrf.mxu0 }
0x13ec   :  { %v2455_v24 = vpop.eup %2454 }
0x13ed   :  { %1008 = vrot.lane.b32.xlu0 %v2455_v24, %s2624_s16 }
0x13ee   :  { %v2457_v26 = vpop.eup %2456 }
0x13ef   :  { %v1002_v27 = vadd.f32 1.0, %v2457_v26 }
0x13f1   :  { %2458 = vrcp.f32 %v1002_v27 }
0x13fe   :  { %v2459_v28 = vpop.eup %2458 }
0x13ff   :  { %v1006_v31 = vmul.f32 %v2459_v28, %v911_v15 }
0x145f   :  { %v1009_v29 = vpop.permute.xlu0 %1008 }
0x1460   :  { %v1011_v30 = vmul.f32 %v2459_v28, %v1009_v29 }
0x1462   :  { %1013 = vrot.lane.b32.xlu1 %v1011_v30, %s2625_s3 }
0x14d4   :  { %v1014_v32 = vpop.permute.xlu1 %1013 }
0x14d5   :  { %v1016_v33 = vadd.f32 %v1014_v32, %v1006_v31 }
0x14d7   :  { %2460 = vtanh.f32 %v1016_v33 }
0x14e4   :  { %v2461_v34 = vpop.eup %2460 }
0x14e5   :  { %1019 = vrot.lane.b32.xlu0 %v2461_v34, %s2624_s16 }
0x1557   :  { %v1020_v41 = vpop.permute.xlu0 %1019 }
0x1558   :  { %v1022_v43 = vmul.f32 %v2459_v28, %v1020_v41 }
0x155a   :  { %1024 = vrot.lane.b32.xlu1 %v1022_v43, %s2625_s3 }
0x15cc   :  { %v1025_v45 = vpop.permute.xlu1 %1024 }
0x15cd   :  { %1028 = vst.msk [vmem:[#allocation2 + $0xe] sm:$0x3] %vm292_vm2, %v1025_v45 }
0x15d4   :  { %v1039_v46 = vld [vmem:[#allocation2 + $0x8] sm:$0xff] }
0x15d5   :  { %2287 = vmatmul.mubr.msk.f32.vlgmr.msra.gmra.mxu1 %vm189_vm3, %v1039_v46 }
0x15d6   :  { %2301 = vmatpush3.msra.mxu1 %v2858_v39  ;;  %2308 = vmatprep.mubr.msk.f32.mxu1 %vm2623_vm0, %v2622_v1 }
0x15d7   :  { %2302 = vmatprep.subr.mxu1 %v2622_v1 }
0x15d8   :  { %2303 = vmatpush3.msra.mxu1 %v2860_v40 }
0x15d9   :  { %2304 = vmatprep.subr.mxu1 %v2622_v1 }
0x15da   :  { %2305 = vmatpush3.msra.mxu1 %v2865_v42 }
0x15db   :  { %2306 = vmatprep.subr.mxu1 %v2622_v1 }
0x15dc   :  { %2307 = vmatpush3.msra.mxu1 %v2869_v44 }
0x15dd   :  { %2322 = vmatprep.subr.mxu1 %v2622_v1 }
0x1695   :  { %v2288_v49 = vpop.f32.mrf.mxu1 }
0x1696   :  { %v1124_v50 = vadd.f32 %v2288_v49, %v2067_v48 }
0x1697   :  { %v1118_v6 = vpop.f32.mrf.mxu1 }
0x1698   :  { %1128 = vst [vmem:[#allocation3 + $0x8] sm:$0xff] %v1124_v50  ;;  %v1119_v51 = vadd.f32 %v2067_v48, %v1118_v6 }
0x169a   :  { %1127 = vst [vmem:[#allocation3] sm:$0xff] %v1119_v51 }
0x16a1   :  { %v1129_v8 = vld [vmem:[#allocation3] sm:$0x3]  ;;  %v1230_v3 = vld [vmem:[#allocation3 + $0x2] sm:$0x3]  ;;  %v1333_v25 = vld [vmem:[#allocation3 + $0x4] sm:$0x3] }
0x16a2   :  { %v1200_v52 = vadd.f32 %v1196_v47, %v1129_v8  ;;  %v1436_v47 = vld [vmem:[#allocation3 + $0x6] sm:$0x3] }
0x16a4   :  { %2462 = vtanh.f32 %v1200_v52  ;;  %v2070_v9 = vmul.f32 -1.442695, %v1200_v52 }
0x16a6   :  { %2464 = vpow2.f32 %v2070_v9 }
0x16b1   :  { %v2463_v53 = vpop.eup %2462 }
0x16b2   :  { %1210 = vrot.lane.b32.xlu0 %v2463_v53, %s2624_s16 }
0x16b3   :  { %v2465_v54 = vpop.eup %2464 }
0x16b4   :  { %v1204_v55 = vadd.f32 1.0, %v2465_v54 }
0x16b6   :  { %2466 = vrcp.f32 %v1204_v55 }
0x16c3   :  { %v2467_v56 = vpop.eup %2466 }
0x16c4   :  { %v1208_v59 = vmul.f32 0.0, %v2467_v56 }
0x1724   :  { %v1211_v57 = vpop.permute.xlu0 %1210 }
0x1725   :  { %v1213_v58 = vmul.f32 %v2467_v56, %v1211_v57 }
0x1727   :  { %1215 = vrot.lane.b32.xlu1 %v1213_v58, %s2625_s3 }
0x1799   :  { %v1216_v60 = vpop.permute.xlu1 %1215 }
0x179a   :  { %v1218_v61 = vadd.f32 %v1216_v60, %v1208_v59 }
0x179c   :  { %2468 = vtanh.f32 %v1218_v61 }
0x17a9   :  { %v2469_v62 = vpop.eup %2468 }
0x17aa   :  { %1221 = vrot.lane.b32.xlu0 %v2469_v62, %s2624_s16 }
0x181c   :  { %v1222_v63 = vpop.permute.xlu0 %1221 }
0x181d   :  { %v1224_v0 = vmul.f32 %v2467_v56, %v1222_v63 }
0x181f   :  { %1226 = vrot.lane.b32.xlu1 %v1224_v0, %s2625_s3 }
0x1891   :  { %v1227_v2 = vpop.permute.xlu1 %1226 }
0x1892   :  { %1229 = vst.msk [vmem:[#allocation2] sm:$0x3] %vm292_vm2, %v1227_v2  ;;  %2309 = vmatmul.mubr.msk.f32.vlgmr.msra.gmra.mxu1 %vm189_vm3, %v1227_v2 }
0x1893   :  { %2323 = vmatpush3.msra.mxu1 %v2858_v39  ;;  %2330 = vmatprep.mubr.msk.f32.mxu1 %vm2623_vm0, %v2622_v1 }
0x1894   :  { %2324 = vmatprep.subr.mxu1 %v2622_v1 }
0x1895   :  { %2325 = vmatpush3.msra.mxu1 %v2860_v40 }
0x1896   :  { %2326 = vmatprep.subr.mxu1 %v2622_v1 }
0x1897   :  { %2327 = vmatpush3.msra.mxu1 %v2865_v42 }
0x1898   :  { %2328 = vmatprep.subr.mxu1 %v2622_v1 }
0x1899   :  { %2329 = vmatpush3.msra.mxu1 %v2869_v44 }
0x189a   :  { %2344 = vmatprep.subr.mxu1 %v2622_v1 }
0x1952   :  { %v1299_v4 = vpop.f32.mrf.mxu1 }
0x1953   :  { %v1303_v7 = vadd.f32 %v1299_v4, %v1230_v3 }
0x1954   :  { %v2310_v10 = vpop.f32.mrf.mxu1 }
0x1955   :  { %2470 = vtanh.f32 %v1303_v7  ;;  %v2072_v12 = vmul.f32 -1.442695, %v1303_v7 }
0x1957   :  { %2472 = vpow2.f32 %v2072_v12 }
0x1962   :  { %v2471_v11 = vpop.eup %2470 }
0x1963   :  { %1313 = vrot.lane.b32.xlu0 %v2471_v11, %s2624_s16 }
0x1964   :  { %v2473_v13 = vpop.eup %2472 }
0x1965   :  { %v1307_v14 = vadd.f32 1.0, %v2473_v13 }
0x1967   :  { %2474 = vrcp.f32 %v1307_v14 }
0x1974   :  { %v2475_v15 = vpop.eup %2474 }
0x1975   :  { %v1311_v18 = vmul.f32 %v2475_v15, %v1218_v61  ;;  %v1539_v61 = vld [vmem:[#allocation3 + $0x8] sm:$0x3] }
0x19d5   :  { %v1314_v16 = vpop.permute.xlu0 %1313 }
0x19d6   :  { %v1316_v17 = vmul.f32 %v2475_v15, %v1314_v16 }
0x19d8   :  { %1318 = vrot.lane.b32.xlu1 %v1316_v17, %s2625_s3 }
0x1a4a   :  { %v1319_v19 = vpop.permute.xlu1 %1318 }
0x1a4b   :  { %v1321_v20 = vadd.f32 %v1319_v19, %v1311_v18 }
0x1a4d   :  { %2476 = vtanh.f32 %v1321_v20 }
0x1a5a   :  { %v2477_v21 = vpop.eup %2476 }
0x1a5b   :  { %1324 = vrot.lane.b32.xlu0 %v2477_v21, %s2624_s16 }
0x1acd   :  { %v1325_v22 = vpop.permute.xlu0 %1324 }
0x1ace   :  { %v1327_v23 = vmul.f32 %v2475_v15, %v1325_v22 }
0x1ad0   :  { %1329 = vrot.lane.b32.xlu1 %v1327_v23, %s2625_s3 }
0x1b42   :  { %v1330_v24 = vpop.permute.xlu1 %1329 }
0x1b43   :  { %1332 = vst.msk [vmem:[#allocation2 + $0x2] sm:$0x3] %vm292_vm2, %v1330_v24  ;;  %2320 = vmatmul.mubr.msk.f32.vlgmr.msra.gmra.mxu0 %vm189_vm3, %v1330_v24 }
0x1b44   :  { %2334 = vmatpush3.msra.mxu0 %v2858_v39  ;;  %2341 = vmatprep.mubr.msk.f32.mxu0 %vm2623_vm0, %v2622_v1 }
0x1b45   :  { %2335 = vmatprep.subr.mxu0 %v2622_v1 }
0x1b46   :  { %2336 = vmatpush3.msra.mxu0 %v2860_v40 }
0x1b47   :  { %2337 = vmatprep.subr.mxu0 %v2622_v1 }
0x1b48   :  { %2338 = vmatpush3.msra.mxu0 %v2865_v42 }
0x1b49   :  { %2339 = vmatprep.subr.mxu0 %v2622_v1 }
0x1b4a   :  { %2340 = vmatpush3.msra.mxu0 %v2869_v44 }
0x1b4b   :  { %2355 = vmatprep.subr.mxu0 %v2622_v1 }
0x1c03   :  { %v1402_v26 = vpop.f32.mrf.mxu0 }
0x1c04   :  { %v1406_v27 = vadd.f32 %v1402_v26, %v1333_v25 }
0x1c05   :  { %v2321_v28 = vpop.f32.mrf.mxu0 }
0x1c06   :  { %2478 = vtanh.f32 %v1406_v27  ;;  %v2074_v30 = vmul.f32 -1.442695, %v1406_v27 }
0x1c08   :  { %2480 = vpow2.f32 %v2074_v30 }
0x1c13   :  { %v2479_v29 = vpop.eup %2478 }
0x1c14   :  { %1416 = vrot.lane.b32.xlu0 %v2479_v29, %s2624_s16 }
0x1c15   :  { %v2481_v31 = vpop.eup %2480 }
0x1c16   :  { %v1410_v32 = vadd.f32 1.0, %v2481_v31 }
0x1c18   :  { %2482 = vrcp.f32 %v1410_v32 }
0x1c25   :  { %v2483_v33 = vpop.eup %2482 }
0x1c26   :  { %v1414_v36 = vmul.f32 %v2483_v33, %v1321_v20  ;;  %v1642_v20 = vld [vmem:[#allocation3 + $0xa] sm:$0x3] }
0x1c86   :  { %v1417_v34 = vpop.permute.xlu0 %1416 }
0x1c87   :  { %v1419_v35 = vmul.f32 %v2483_v33, %v1417_v34  ;;  %v1745_v34 = vld [vmem:[#allocation3 + $0xc] sm:$0x3] }
0x1c89   :  { %1421 = vrot.lane.b32.xlu1 %v1419_v35, %s2625_s3 }
0x1cfb   :  { %v1422_v37 = vpop.permute.xlu1 %1421 }
0x1cfc   :  { %v1424_v38 = vadd.f32 %v1422_v37, %v1414_v36 }
0x1cfe   :  { %2484 = vtanh.f32 %v1424_v38 }
0x1d0b   :  { %v2485_v41 = vpop.eup %2484 }
0x1d0c   :  { %1427 = vrot.lane.b32.xlu0 %v2485_v41, %s2624_s16 }
0x1d7e   :  { %v1428_v43 = vpop.permute.xlu0 %1427 }
0x1d7f   :  { %v1430_v45 = vmul.f32 %v2483_v33, %v1428_v43 }
0x1d81   :  { %1432 = vrot.lane.b32.xlu1 %v1430_v45, %s2625_s3 }
0x1df3   :  { %v1433_v46 = vpop.permute.xlu1 %1432 }
0x1df4   :  { %1435 = vst.msk [vmem:[#allocation2 + $0x4] sm:$0x3] %vm292_vm2, %v1433_v46  ;;  %2331 = vmatmul.mubr.msk.f32.vlgmr.msra.gmra.mxu1 %vm189_vm3, %v1433_v46 }
0x1df5   :  { %2345 = vmatpush3.msra.mxu1 %v2858_v39  ;;  %2352 = vmatprep.mubr.msk.f32.mxu1 %vm2623_vm0, %v2622_v1 }
0x1df6   :  { %2346 = vmatprep.subr.mxu1 %v2622_v1 }
0x1df7   :  { %2347 = vmatpush3.msra.mxu1 %v2860_v40 }
0x1df8   :  { %2348 = vmatprep.subr.mxu1 %v2622_v1 }
0x1df9   :  { %2349 = vmatpush3.msra.mxu1 %v2865_v42 }
0x1dfa   :  { %2350 = vmatprep.subr.mxu1 %v2622_v1 }
0x1dfb   :  { %2351 = vmatpush3.msra.mxu1 %v2869_v44 }
0x1dfc   :  { %2366 = vmatprep.subr.mxu1 %v2622_v1 }
0x1eb4   :  { %v1505_v5 = vpop.f32.mrf.mxu1 }
0x1eb5   :  { %v1509_v48 = vadd.f32 %v1505_v5, %v1436_v47 }
0x1eb6   :  { %v2332_v49 = vpop.f32.mrf.mxu1 }
0x1eb7   :  { %2486 = vtanh.f32 %v1509_v48  ;;  %v2076_v6 = vmul.f32 -1.442695, %v1509_v48 }
0x1eb9   :  { %2488 = vpow2.f32 %v2076_v6 }
0x1ec4   :  { %v2487_v50 = vpop.eup %2486 }
0x1ec5   :  { %1519 = vrot.lane.b32.xlu0 %v2487_v50, %s2624_s16 }
0x1ec6   :  { %v2489_v51 = vpop.eup %2488 }
0x1ec7   :  { %v1513_v8 = vadd.f32 1.0, %v2489_v51 }
0x1ec9   :  { %2490 = vrcp.f32 %v1513_v8 }
0x1ed6   :  { %v2491_v52 = vpop.eup %2490 }
0x1ed7   :  { %v1517_v54 = vmul.f32 %v2491_v52, %v1424_v38 }
0x1f37   :  { %v1520_v53 = vpop.permute.xlu0 %1519 }
0x1f38   :  { %v1522_v9 = vmul.f32 %v2491_v52, %v1520_v53  ;;  %v1848_v53 = vld [vmem:[#allocation3 + $0xe] sm:$0x3] }
0x1f3a   :  { %1524 = vrot.lane.b32.xlu1 %v1522_v9, %s2625_s3 }
0x1fac   :  { %v1525_v55 = vpop.permute.xlu1 %1524 }
0x1fad   :  { %v1527_v56 = vadd.f32 %v1525_v55, %v1517_v54 }
0x1faf   :  { %2492 = vtanh.f32 %v1527_v56 }
0x1fbc   :  { %v2493_v57 = vpop.eup %2492 }
0x1fbd   :  { %1530 = vrot.lane.b32.xlu0 %v2493_v57, %s2624_s16 }
0x202f   :  { %v1531_v58 = vpop.permute.xlu0 %1530 }
0x2030   :  { %v1533_v59 = vmul.f32 %v2491_v52, %v1531_v58 }
0x2032   :  { %1535 = vrot.lane.b32.xlu1 %v1533_v59, %s2625_s3 }
0x20a4   :  { %v1536_v60 = vpop.permute.xlu1 %1535 }
0x20a5   :  { %1538 = vst.msk [vmem:[#allocation2 + $0x6] sm:$0x3] %vm292_vm2, %v1536_v60  ;;  %2342 = vmatmul.mubr.msk.f32.vlgmr.msra.gmra.mxu0 %vm189_vm3, %v1536_v60 }
0x20a6   :  { %2356 = vmatpush3.msra.mxu0 %v2858_v39  ;;  %2363 = vmatprep.mubr.msk.f32.mxu0 %vm2623_vm0, %v2622_v1 }
0x20a7   :  { %2357 = vmatprep.subr.mxu0 %v2622_v1 }
0x20a8   :  { %2358 = vmatpush3.msra.mxu0 %v2860_v40 }
0x20a9   :  { %2359 = vmatprep.subr.mxu0 %v2622_v1 }
0x20aa   :  { %2360 = vmatpush3.msra.mxu0 %v2865_v42 }
0x20ab   :  { %2361 = vmatprep.subr.mxu0 %v2622_v1 }
0x20ac   :  { %2362 = vmatpush3.msra.mxu0 %v2869_v44 }
0x20ad   :  { %2377 = vmatprep.subr.mxu0 %v2622_v1 }
0x2165   :  { %v1608_v62 = vpop.f32.mrf.mxu0 }
0x2166   :  { %v1612_v63 = vadd.f32 %v1608_v62, %v1539_v61 }
0x2167   :  { %v2343_v0 = vpop.f32.mrf.mxu0 }
0x2168   :  { %2494 = vtanh.f32 %v1612_v63  ;;  %v2078_v3 = vmul.f32 -1.442695, %v1612_v63 }
0x216a   :  { %2496 = vpow2.f32 %v2078_v3  ;;  %v1954_v3 = vld [vmem:[%s3026_s7 + $0x18] sm:$0xff] }
0x2175   :  { %v2495_v2 = vpop.eup %2494 }
0x2176   :  { %1622 = vrot.lane.b32.xlu0 %v2495_v2, %s2624_s16 }
0x2177   :  { %v2497_v4 = vpop.eup %2496 }
0x2178   :  { %v1616_v7 = vadd.f32 1.0, %v2497_v4  ;;  %v1953_v4 = vld [vmem:[%s3026_s7 + $0x10] sm:$0xff] }
0x217a   :  { %2498 = vrcp.f32 %v1616_v7  ;;  %v1952_v7 = vld [vmem:[%s3026_s7 + $0x8] sm:$0xff] }
0x2187   :  { %v2499_v10 = vpop.eup %2498 }
0x2188   :  { %v1620_v13 = vmul.f32 %v2499_v10, %v1527_v56 }
0x21e8   :  { %v1623_v11 = vpop.permute.xlu0 %1622 }
0x21e9   :  { %v1625_v12 = vmul.f32 %v2499_v10, %v1623_v11 }
0x21eb   :  { %1627 = vrot.lane.b32.xlu1 %v1625_v12, %s2625_s3 }
0x225d   :  { %v1628_v14 = vpop.permute.xlu1 %1627 }
0x225e   :  { %v1630_v15 = vadd.f32 %v1628_v14, %v1620_v13 }
0x2260   :  { %2500 = vtanh.f32 %v1630_v15 }
0x226d   :  { %v2501_v16 = vpop.eup %2500 }
0x226e   :  { %1633 = vrot.lane.b32.xlu0 %v2501_v16, %s2624_s16 }
0x22e0   :  { %v1634_v17 = vpop.permute.xlu0 %1633 }
0x22e1   :  { %v1636_v18 = vmul.f32 %v2499_v10, %v1634_v17  ;;  %v1951_v10 = vld [vmem:[%s3026_s7] sm:$0xff] }
0x22e3   :  { %1638 = vrot.lane.b32.xlu1 %v1636_v18, %s2625_s3 }
0x2355   :  { %v1639_v19 = vpop.permute.xlu1 %1638 }
0x2356   :  { %1641 = vst.msk [vmem:[#allocation2 + $0x8] sm:$0x3] %vm292_vm2, %v1639_v19  ;;  %2353 = vmatmul.mubr.msk.f32.vlgmr.msra.gmra.mxu1 %vm189_vm3, %v1639_v19 }
0x2357   :  { %2367 = vmatpush3.msra.mxu1 %v2858_v39  ;;  %2374 = vmatprep.mubr.msk.f32.mxu1 %vm2623_vm0, %v2622_v1 }
0x2358   :  { %2368 = vmatprep.subr.mxu1 %v2622_v1 }
0x2359   :  { %2369 = vmatpush3.msra.mxu1 %v2860_v40 }
0x235a   :  { %2370 = vmatprep.subr.mxu1 %v2622_v1 }
0x235b   :  { %2371 = vmatpush3.msra.mxu1 %v2865_v42 }
0x235c   :  { %2372 = vmatprep.subr.mxu1 %v2622_v1 }
0x235d   :  { %2373 = vmatpush3.msra.mxu1 %v2869_v44 }
0x2416   :  { %v1711_v21 = vpop.f32.mrf.mxu1 }
0x2417   :  { %v1715_v22 = vadd.f32 %v1711_v21, %v1642_v20 }
0x2418   :  { %v2354_v23 = vpop.f32.mrf.mxu1 }
0x2419   :  { %2502 = vtanh.f32 %v1715_v22  ;;  %v2080_v24 = vmul.f32 -1.442695, %v1715_v22 }
0x241b   :  { %2504 = vpow2.f32 %v2080_v24 }
0x2426   :  { %v2503_v39 = vpop.eup %2502 }
0x2427   :  { %1725 = vrot.lane.b32.xlu0 %v2503_v39, %s2624_s16 }
0x2428   :  { %v2505_v25 = vpop.eup %2504 }
0x2429   :  { %v1719_v40 = vadd.f32 1.0, %v2505_v25 }
0x242b   :  { %2506 = vrcp.f32 %v1719_v40 }
0x2438   :  { %v2507_v26 = vpop.eup %2506 }
0x2439   :  { %v1723_v28 = vmul.f32 %v2507_v26, %v1630_v15  ;;  %v2085_v15 = vld [vmem:[#allocation4] ss:$0 sm:$0xff] }
0x2499   :  { %v1726_v27 = vpop.permute.xlu0 %1725 }
0x249a   :  { %v1728_v42 = vmul.f32 %v2507_v26, %v1726_v27 }
0x249c   :  { %1730 = vrot.lane.b32.xlu1 %v1728_v42, %s2625_s3 }
0x250e   :  { %v1731_v44 = vpop.permute.xlu1 %1730 }
0x250f   :  { %v1733_v29 = vadd.f32 %v1731_v44, %v1723_v28 }
0x2511   :  { %2508 = vtanh.f32 %v1733_v29 }
0x251e   :  { %v2509_v30 = vpop.eup %2508 }
0x251f   :  { %1736 = vrot.lane.b32.xlu0 %v2509_v30, %s2624_s16 }
0x2591   :  { %v1737_v31 = vpop.permute.xlu0 %1736 }
0x2592   :  { %v1739_v32 = vmul.f32 %v2507_v26, %v1737_v31 }
0x2594   :  { %1741 = vrot.lane.b32.xlu1 %v1739_v32, %s2625_s3 }
0x2606   :  { %v1742_v33 = vpop.permute.xlu1 %1741 }
0x2607   :  { %1744 = vst.msk [vmem:[#allocation2 + $0xa] sm:$0x3] %vm292_vm2, %v1742_v33  ;;  %2364 = vmatmul.mubr.msk.f32.vlgmr.msra.gmra.mxu0 %vm189_vm3, %v1742_v33 }
0x2608   :  { %2385 = vmatprep.mubr.msk.f32.mxu0 %vm2623_vm0, %v2622_v1  ;;  %2378 = vmatpush3.msra.mxu0 %v1954_v3 }
0x2609   :  { %2379 = vmatprep.subr.mxu0 %v2622_v1 }
0x260a   :  { %2380 = vmatpush3.msra.mxu0 %v1953_v4 }
0x260b   :  { %2381 = vmatprep.subr.mxu0 %v2622_v1 }
0x260c   :  { %2382 = vmatpush3.msra.mxu0 %v1952_v7 }
0x260d   :  { %2383 = vmatprep.subr.mxu0 %v2622_v1 }
0x260e   :  { %2384 = vmatpush3.msra.mxu0 %v1951_v10 }
0x26c7   :  { %v1814_v35 = vpop.f32.mrf.mxu0 }
0x26c8   :  { %v1818_v36 = vadd.f32 %v1814_v35, %v1745_v34 }
0x26c9   :  { %v2365_v37 = vpop.f32.mrf.mxu0 }
0x26ca   :  { %2510 = vtanh.f32 %v1818_v36  ;;  %v2082_v41 = vmul.f32 -1.442695, %v1818_v36 }
0x26cc   :  { %2512 = vpow2.f32 %v2082_v41 }
0x26d7   :  { %v2511_v38 = vpop.eup %2510 }
0x26d8   :  { %1828 = vrot.lane.b32.xlu0 %v2511_v38, %s2624_s16 }
0x26d9   :  { %v2513_v43 = vpop.eup %2512 }
0x26da   :  { %v1822_v45 = vadd.f32 1.0, %v2513_v43 }
0x26dc   :  { %2514 = vrcp.f32 %v1822_v45 }
0x26e9   :  { %v2515_v46 = vpop.eup %2514 }
0x26ea   :  { %v1826_v48 = vmul.f32 %v2515_v46, %v1733_v29 }
0x274a   :  { %v1829_v47 = vpop.permute.xlu0 %1828 }
0x274b   :  { %v1831_v5 = vmul.f32 %v2515_v46, %v1829_v47 }
0x274d   :  { %1833 = vrot.lane.b32.xlu1 %v1831_v5, %s2625_s3 }
0x27bf   :  { %v1834_v49 = vpop.permute.xlu1 %1833 }
0x27c0   :  { %v1836_v50 = vadd.f32 %v1834_v49, %v1826_v48 }
0x27c2   :  { %2516 = vtanh.f32 %v1836_v50 }
0x27cf   :  { %v2517_v6 = vpop.eup %2516 }
0x27d0   :  { %1839 = vrot.lane.b32.xlu0 %v2517_v6, %s2624_s16 }
0x2842   :  { %v1840_v51 = vpop.permute.xlu0 %1839 }
0x2843   :  { %v1842_v8 = vmul.f32 %v2515_v46, %v1840_v51 }
0x2845   :  { %1844 = vrot.lane.b32.xlu1 %v1842_v8, %s2625_s3 }
0x28b7   :  { %v1845_v52 = vpop.permute.xlu1 %1844 }
0x28b8   :  { %1847 = vst.msk [vmem:[#allocation2 + $0xc] sm:$0x3] %vm292_vm2, %v1845_v52  ;;  %2375 = vmatmul.mubr.msk.f32.vlgmr.msra.gmra.mxu1 %vm189_vm3, %v1845_v52 }
0x2978   :  { %v1917_v9 = vpop.f32.mrf.mxu1 }
0x2979   :  { %v1921_v54 = vadd.f32 %v1917_v9, %v1848_v53 }
0x297a   :  { %v2376_v55 = vpop.f32.mrf.mxu1 }
0x297b   :  { %2518 = vtanh.f32 %v1921_v54  ;;  %v2084_v57 = vmul.f32 -1.442695, %v1921_v54 }
0x297d   :  { %2520 = vpow2.f32 %v2084_v57 }
0x2988   :  { %v2519_v56 = vpop.eup %2518 }
0x2989   :  { %1931 = vrot.lane.b32.xlu0 %v2519_v56, %s2624_s16 }
0x298a   :  { %v2521_v58 = vpop.eup %2520 }
0x298b   :  { %v1925_v59 = vadd.f32 1.0, %v2521_v58 }
0x298d   :  { %2522 = vrcp.f32 %v1925_v59 }
0x299a   :  { %v2523_v60 = vpop.eup %2522 }
0x299b   :  { %v1929_v63 = vmul.f32 %v2523_v60, %v1836_v50 }
0x29fb   :  { %v1932_v61 = vpop.permute.xlu0 %1931 }
0x29fc   :  { %v1934_v62 = vmul.f32 %v2523_v60, %v1932_v61 }
0x29fe   :  { %1936 = vrot.lane.b32.xlu1 %v1934_v62, %s2625_s3 }
0x2a70   :  { %v1937_v0 = vpop.permute.xlu1 %1936 }
0x2a71   :  { %v1939_v2 = vadd.f32 %v1937_v0, %v1929_v63 }
0x2a73   :  { %2524 = vtanh.f32 %v1939_v2 }
0x2a80   :  { %v2525_v11 = vpop.eup %2524 }
0x2a81   :  { %1942 = vrot.lane.b32.xlu0 %v2525_v11, %s2624_s16 }
0x2af3   :  { %v1943_v12 = vpop.permute.xlu0 %1942 }
0x2af4   :  { %v1945_v13 = vmul.f32 %v2523_v60, %v1943_v12 }
0x2af6   :  { %1947 = vrot.lane.b32.xlu1 %v1945_v13, %s2625_s3 }
0x2b68   :  { %v1948_v14 = vpop.permute.xlu1 %1947 }
0x2b69   :  { %1950 = vst.msk [vmem:[#allocation2 + $0xe] sm:$0x3] %vm292_vm2, %v1948_v14  ;;  %2386 = vmatmul.mubr.msk.f32.vlgmr.msra.gmra.mxu0 %vm189_vm3, %v1948_v14 }
0x2c29   :  { %v2030_v16 = vpop.f32.mrf.mxu0 }
0x2c2a   :  { %v2031_v17 = vadd.f32 %v2085_v15, %v2030_v16 }
0x2c2b   :  { %v2387_v18 = vpop.f32.mrf.mxu0 }
0x2c2c   :  { %v2087_v19 = vmul.f32 -1.442695, %v2031_v17 }
0x2c2e   :  { %2526 = vpow2.f32 %v2087_v19 }
0x2c3b   :  { %v2527_v1 = vpop.eup %2526 }
0x2c3c   :  { %v2037_v20 = vadd.f32 1.0, %v2527_v1 }
0x2c3e   :  { %2528 = vrcp.f32 %v2037_v20 }
0x2c4b   :  { %v2529_v21 = vpop.eup %2528 }
0x2c4c   :  { %2041 = vst.msk [vmem:[%s3028_s9] sm:$0x3] %vm2040_vm4, %v2529_v21 }
0x2c4d   :  { %2046 = vsyncpa [#allocation6], 1 }
0x2c4e   :  { %2047 = vsyncpa [#allocation8], 1 }
0x2c4f   :  { %2048 = vsyncpa [#allocation11], 1 }

</bundles_post_ra>
